<compile_context>
chip_gen: v7x
topology: tpu7x:2x2x1
jax: 0.10.0
libtpu: 0.0.40
codegen_flags: <defaults>
</compile_context>

<pallas_src>
import jax
import jax.numpy as jnp
from jax.scipy.linalg import block_diag
from jax.experimental import pallas as pl
from jax.experimental.pallas import tpu as pltpu

# ----------------------------- config (mirrors "opt") -----------------------------
BOTTLENECK   = 32          # opt.bottleneck_size  (PointNet nlatent)
HIDDEN       = 32          # opt.hidden_neurons
NUM_LAYERS   = 2           # opt.num_layers
NB_PRIM      = 2           # opt.nb_primitives
NUM_POINTS   = 128         # opt.number_points
PTS_PER_PRIM = NUM_POINTS // NB_PRIM
DIM_TEMPLATE = 2           # SQUARE template (2-D UV patches)
N_IN_PTS     = 128         # input point-cloud size
BATCH        = 2
BN_EPS       = 1e-5

ENC_C1 = 64                # PointNet conv1 out channels
ENC_C2 = 128               # PointNet conv2 out channels
ENC_LANES = BATCH * N_IN_PTS          # 256 (encoder trunk lane width)
DEC_LANES = BATCH * PTS_PER_PRIM      # 128 (decoder lane width)

W_SLAB_COLS = 128
B_SLAB_COLS = ENC_LANES               # biases pre-broadcast to the widest lane count


# ----------------------------- slab layouts (static, Python ints) -----------------------------
def _align8(n):
    return ((n + 7) // 8) * 8


def _build_weight_layout():
    entries = [
        ("ew1", ENC_C1, 3),
        ("ew2", ENC_C2, ENC_C1),
        ("ew3", BOTTLENECK, ENC_C2),
        ("ewl1", BOTTLENECK, BOTTLENECK),
        ("ewl2", BOTTLENECK, BOTTLENECK),
        ("dw1", NB_PRIM * BOTTLENECK, NB_PRIM * DIM_TEMPLATE),
        ("dw2", NB_PRIM * HIDDEN, NB_PRIM * BOTTLENECK),
    ]
    for i in range(NUM_LAYERS):
        entries.append((f"dwl{i}", NB_PRIM * HIDDEN, NB_PRIM * HIDDEN))
    entries.append(("dwlast", NB_PRIM * 3, NB_PRIM * HIDDEN))
    layout, off = {}, 0
    for name, r, c in entries:
        layout[name] = (off, r, c)
        off += _align8(r)
    return layout, off


def _build_bias_layout():
    entries = [
        ("eb1", ENC_C1), ("eb2", ENC_C2), ("eb3", BOTTLENECK),
        ("ebl1", BOTTLENECK), ("ebl2", BOTTLENECK),
        ("dc1", NB_PRIM * BOTTLENECK), ("ds1", NB_PRIM * BOTTLENECK),
        ("db2", NB_PRIM * HIDDEN),
    ]
    for i in range(NUM_LAYERS):
        entries.append((f"dbl{i}", NB_PRIM * HIDDEN))
    entries.append(("dblast", NB_PRIM * 3))
    layout, off = {}, 0
    for name, r in entries:
        layout[name] = (off, r)
        off += _align8(r)
    return layout, off


_W_LAYOUT, _W_ROWS = _build_weight_layout()
_B_LAYOUT, _B_ROWS = _build_bias_layout()


# ----------------------------- fused Pallas kernel -----------------------------
def _fused_kernel(x_ref, t_ref, w_ref, b_ref, out_ref):
    f32 = jnp.float32

    def W(name):
        off, r, c = _W_LAYOUT[name]
        return w_ref[off:off + r, 0:c]

    def B(name, width):
        off, r = _B_LAYOUT[name]
        return b_ref[off:off + r, 0:width]

    x = x_ref[...]                                              # (3, B*N) = (3, 256)

    # --- encoder conv1 (K=3) on the VPU (BN scale folded into the weight) ---
    w1 = W("ew1")                                               # (64, 3)
    h = B("eb1", ENC_LANES)                                     # (64, 256) pre-broadcast bias
    for k in range(3):
        h = h + w1[:, k:k + 1] * x[k:k + 1, :]
    h = jnp.maximum(h, 0.0)

    # --- encoder conv2 / conv3 on the MXU ---
    h = jnp.maximum(jnp.dot(W("ew2"), h, preferred_element_type=f32) + B("eb2", ENC_LANES), 0.0)
    h = jnp.dot(W("ew3"), h, preferred_element_type=f32) + B("eb3", ENC_LANES)   # no relu

    # --- per-batch max over points (lane reduce over 128-aligned slices) ---
    g = jnp.concatenate(
        [jnp.max(h[:, b * N_IN_PTS:(b + 1) * N_IN_PTS], axis=1, keepdims=True)
         for b in range(BATCH)], axis=1)                        # (bneck, B)

    # --- lin1 / lin2 (BN folded) -> latent (bneck, B) ---
    g = jnp.maximum(jnp.dot(W("ewl1"), g, preferred_element_type=f32) + B("ebl1", BATCH), 0.0)
    g = jnp.maximum(jnp.dot(W("ewl2"), g, preferred_element_type=f32) + B("ebl2", BATCH), 0.0)

    # --- latent lane-broadcast, built once; stacked over primitives & scaled by BN1 scale ---
    g_lanes = jnp.concatenate(
        [jnp.broadcast_to(g[:, b:b + 1], (BOTTLENECK, PTS_PER_PRIM)) for b in range(BATCH)],
        axis=1)                                                 # (bneck, B*Nper)
    g_stk = jnp.concatenate([g_lanes] * NB_PRIM, axis=0) * B("ds1", DEC_LANES)   # (P*bneck, B*Nper)

    # --- decoder conv1 (K=P*2=4) on the VPU, both primitives at once (block-diag weights) ---
    t = t_ref[...]                                              # (P*2, B*Nper) = (4, 128)
    dw1 = W("dw1")                                              # (P*bneck, P*2) block-diagonal
    h = B("dc1", DEC_LANES) + g_stk
    for k in range(NB_PRIM * DIM_TEMPLATE):
        h = h + dw1[:, k:k + 1] * t[k:k + 1, :]
    h = jnp.maximum(h, 0.0)                                     # (64, 128)

    # --- decoder trunk: block-diagonal stacked matmuls (one MXU chain for both primitives) ---
    h = jnp.maximum(jnp.dot(W("dw2"), h, preferred_element_type=f32) + B("db2", DEC_LANES), 0.0)
    for i in range(NUM_LAYERS):
        h = jnp.maximum(jnp.dot(W(f"dwl{i}"), h, preferred_element_type=f32)
                        + B(f"dbl{i}", DEC_LANES), 0.0)
    out_ref[...] = jnp.dot(W("dwlast"), h, preferred_element_type=f32) + B("dblast", DEC_LANES)


# ----------------------------- parameter packing (plain JAX, done once) -----------------------------
def pack_params(enc_params, dec_params):
    w_slab = jnp.zeros((_W_ROWS, W_SLAB_COLS), jnp.float32)
    b_slab = jnp.zeros((_B_ROWS, B_SLAB_COLS), jnp.float32)

    def put_w(slab, name, mat):
        off, r, c = _W_LAYOUT[name]
        return slab.at[off:off + r, 0:c].set(mat.astype(jnp.float32))

    def put_b(slab, name, vec):
        off, r = _B_LAYOUT[name]
        vec = vec.reshape(-1, 1).astype(jnp.float32)
        return slab.at[off:off + r, :].set(jnp.broadcast_to(vec, (r, B_SLAB_COLS)))

    # encoder: fold BN scale into the weight; eff_bias already = scale*b + shift
    (e1, e2, e3, el1, el2) = enc_params
    for name_w, name_b, (w, s, b) in [("ew1", "eb1", e1), ("ew2", "eb2", e2), ("ew3", "eb3", e3),
                                      ("ewl1", "ebl1", el1), ("ewl2", "ebl2", el2)]:
        w_slab = put_w(w_slab, name_w, s * w)
        b_slab = put_b(b_slab, name_b, b)

    # decoder: block-diagonal merge over primitives, BN scale folded into weights
    (W1, CB1, S1, SH1, W2, S2, B2, WL, SL, BL, WLAST, BLAST) = dec_params
    w_slab = put_w(w_slab, "dw1", block_diag(*[S1[p] * W1[p] for p in range(NB_PRIM)]))
    b_slab = put_b(b_slab, "dc1", jnp.concatenate([S1[p] * CB1[p] + SH1[p] for p in range(NB_PRIM)], 0))
    b_slab = put_b(b_slab, "ds1", jnp.concatenate([S1[p] for p in range(NB_PRIM)], 0))
    w_slab = put_w(w_slab, "dw2", block_diag(*[S2[p] * W2[p] for p in range(NB_PRIM)]))
    b_slab = put_b(b_slab, "db2", jnp.concatenate([B2[p] for p in range(NB_PRIM)], 0))
    for i in range(NUM_LAYERS):
        w_slab = put_w(w_slab, f"dwl{i}", block_diag(*[SL[p, i] * WL[p, i] for p in range(NB_PRIM)]))
        b_slab = put_b(b_slab, f"dbl{i}", jnp.concatenate([BL[p, i] for p in range(NB_PRIM)], 0))
    w_slab = put_w(w_slab, "dwlast", block_diag(*[WLAST[p] for p in range(NB_PRIM)]))
    b_slab = put_b(b_slab, "dblast", jnp.concatenate([BLAST[p] for p in range(NB_PRIM)], 0))
    return w_slab, b_slab


# ----------------------------- wrapper -----------------------------
def encoder_decoder_forward(x_nchw, templates, packed):
    """Full EncoderDecoder.forward(x, train=True).  x_nchw: (B, 3, N), PyTorch Conv1d layout."""
    w_slab, b_slab = packed
    # layout plumbing in the wrapper (costs ~nothing): flatten batch onto lanes
    x_flat = jnp.transpose(x_nchw.astype(jnp.float32), (1, 0, 2)).reshape(3, BATCH * N_IN_PTS)
    # templates are shared across the batch: tile across batch, stack over primitives
    t_stk = jnp.tile(templates.astype(jnp.float32), (1, 1, BATCH)).reshape(
        NB_PRIM * DIM_TEMPLATE, BATCH * PTS_PER_PRIM)

    vmem = pl.BlockSpec(memory_space=pltpu.MemorySpace.VMEM)
    out = pl.pallas_call(
        _fused_kernel,
        out_shape=jax.ShapeDtypeStruct((NB_PRIM * 3, BATCH * PTS_PER_PRIM), jnp.float32),
        in_specs=[vmem, vmem, vmem, vmem],
        out_specs=vmem,
    )(x_flat, t_stk, w_slab, b_slab)

    # (P*3, B*Nper) lane-dense kernel output -> (B, P, Nper, 3); tiny transpose in plain JAX.
    out = out.reshape(NB_PRIM, 3, BATCH, PTS_PER_PRIM)
    return jnp.transpose(out, (2, 0, 3, 1))


# ----------------------------- deterministic parameter setup -----------------------------
def _bn_fold(key, c):
    kg, kb, km, kv = jax.random.split(key, 4)
    gamma = 1.0 + 0.1 * jax.random.normal(kg, (c, 1), jnp.float32)
    beta = 0.1 * jax.random.normal(kb, (c, 1), jnp.float32)
    mean = 0.1 * jax.random.normal(km, (c, 1), jnp.float32)
    var = jax.random.uniform(kv, (c, 1), jnp.float32, 0.5, 1.5)
    scale = gamma / jnp.sqrt(var + BN_EPS)
    shift = beta - mean * scale
    return scale, shift


def _conv_bn(key, cin, cout, fold_bias=True):
    """Channel-first: W (cout,cin), scale/eff_bias (cout,1).  BN folded for eval mode."""
    kw, kb, kbn = jax.random.split(key, 3)
    w = 0.3 * jax.random.normal(kw, (cout, cin), jnp.float32)
    b = 0.1 * jax.random.normal(kb, (cout, 1), jnp.float32)
    scale, shift = _bn_fold(kbn, cout)
    eff_bias = scale * b + shift if fold_bias else shift
    return w, scale, eff_bias, b


def make_encoder_params(key):
    ks = jax.random.split(key, 5)
    dims = [(3, ENC_C1), (ENC_C1, ENC_C2), (ENC_C2, BOTTLENECK),
            (BOTTLENECK, BOTTLENECK), (BOTTLENECK, BOTTLENECK)]
    layers = []
    for k, (ci, co) in zip(ks, dims):
        w, s, b, _ = _conv_bn(k, ci, co)
        layers.append((w, s, b))
    return layers


def make_decoder_params(key):
    W1, CB1, S1, SH1 = [], [], [], []
    W2, S2, B2 = [], [], []
    WL, SL, BL = [], [], []
    WLAST, BLAST = [], []
    keys = jax.random.split(key, NB_PRIM)
    for p in range(NB_PRIM):
        k1, k2, kl, klast = jax.random.split(keys[p], 4)
        # conv1: latent is added before BN -> keep conv bias and BN scale/shift separate.
        w1, s1, sh1, cb1 = _conv_bn(k1, DIM_TEMPLATE, BOTTLENECK, fold_bias=False)
        W1.append(w1); CB1.append(cb1); S1.append(s1); SH1.append(sh1)
        w2, s2, b2, _ = _conv_bn(k2, BOTTLENECK, HIDDEN)
        W2.append(w2); S2.append(s2); B2.append(b2)
        wls, sls, bls = [], [], []
        for k in jax.random.split(kl, NUM_LAYERS):
            w, s, b, _ = _conv_bn(k, HIDDEN, HIDDEN)
            wls.append(w); sls.append(s); bls.append(b)
        WL.append(jnp.stack(wls)); SL.append(jnp.stack(sls)); BL.append(jnp.stack(bls))
        kw, kb = jax.random.split(klast)
        WLAST.append(0.3 * jax.random.normal(kw, (3, HIDDEN), jnp.float32))
        BLAST.append(0.1 * jax.random.normal(kb, (3, 1), jnp.float32))
    stack = jnp.stack
    return (stack(W1), stack(CB1), stack(S1), stack(SH1),
            stack(W2), stack(S2), stack(B2),
            stack(WL), stack(SL), stack(BL),
            stack(WLAST), stack(BLAST))


# ----------------------------- plain-JAX reference (unfolded module semantics) -----------------------------
def reference_forward(x_nchw, enc_params, templates, dec_params):
    hi = jax.lax.Precision.HIGHEST
    x = x_nchw.astype(jnp.float32)                                          # (B, 3, N)
    (w1, s1, b1), (w2, s2, b2), (w3, s3, b3), (wl1, sl1, bl1), (wl2, sl2, bl2) = enc_params
    h = jnp.maximum(jnp.einsum('oc,bcn->bon', w1, x, precision=hi) * s1 + b1, 0.0)
    h = jnp.maximum(jnp.einsum('oc,bcn->bon', w2, h, precision=hi) * s2 + b2, 0.0)
    h = jnp.einsum('oc,bcn->bon', w3, h, precision=hi) * s3 + b3
    g = jnp.max(h, axis=2)                                                  # (B, bneck)
    g = jnp.maximum(jnp.matmul(g, wl1.T, precision=hi) * sl1[:, 0] + bl1[:, 0], 0.0)
    g = jnp.maximum(jnp.matmul(g, wl2.T, precision=hi) * sl2[:, 0] + bl2[:, 0], 0.0)
    (W1, CB1, S1, SH1, W2, S2, B2, WL, SL, BL, WLAST, BLAST) = dec_params
    outs = []
    for p in range(NB_PRIM):
        t = templates[p]                                                    # (2, Nper)
        hh = jnp.matmul(W1[p], t, precision=hi) + CB1[p]                    # (bneck, Nper)
        hh = hh[None] + g[:, :, None]                                       # latent added pre-BN
        hh = jnp.maximum(hh * S1[p] + SH1[p], 0.0)
        hh = jnp.maximum(jnp.einsum('oc,bcn->bon', W2[p], hh, precision=hi) * S2[p] + B2[p], 0.0)
        for i in range(NUM_LAYERS):
            hh = jnp.maximum(
                jnp.einsum('oc,bcn->bon', WL[p, i], hh, precision=hi) * SL[p, i] + BL[p, i], 0.0)
        oo = jnp.einsum('oc,bcn->bon', WLAST[p], hh, precision=hi) + BLAST[p]   # (B, 3, Nper)
        outs.append(jnp.transpose(oo, (0, 2, 1))[:, None])                  # (B, 1, Nper, 3)
    return jnp.concatenate(outs, axis=1)                                    # (B, P, Nper, 3)


# ----------------------------- main -----------------------------
if __name__ == "__main__":
    key_in = jax.random.PRNGKey(0)
    kx, kt = jax.random.split(key_in)
    # input point cloud, PyTorch Conv1d layout (B, 3, N)
    x = jax.random.normal(kx, (BATCH, 3, N_IN_PTS), jnp.float32)
    # train=True path: random UV samples from the SQUARE template, shared across the batch.
    # TODO(synk): generate_mesh()/regular-grid (train=False) path not implemented (mesh export glue).
    templates = jax.random.uniform(kt, (NB_PRIM, DIM_TEMPLATE, PTS_PER_PRIM), jnp.float32)

    kparams = jax.random.PRNGKey(42)
    ke, kd = jax.random.split(kparams)
    enc_params = make_encoder_params(ke)
    dec_params = make_decoder_params(kd)
    packed = pack_params(enc_params, dec_params)     # fold BN + block-diag + slab pack, once

    out = encoder_decoder_forward(x, templates, packed)
    out = jax.block_until_ready(out)

    ref = reference_forward(x, enc_params, templates, dec_params)
    assert out.shape == (BATCH, NB_PRIM, PTS_PER_PRIM, 3)
    assert bool(jnp.allclose(out, ref, atol=1e-3, rtol=1e-3))

    print("KERNEL_OK")
</pallas_src>

<mosaic_0001>
module attributes {stable_mosaic.version = 11 : i64} {
  func.func @_fused_kernel(%arg0: memref<3x256xf32, #tpu.memory_space<vmem>>, %arg1: memref<4x128xf32, #tpu.memory_space<vmem>>, %arg2: memref<552x128xf32, #tpu.memory_space<vmem>>, %arg3: memref<616x256xf32, #tpu.memory_space<vmem>>, %arg4: memref<6x128xf32, #tpu.memory_space<vmem>>) attributes {dimension_semantics = [], scalar_prefetch = 0 : i64, scratch_operands = 0 : i64, tpu.core_type = #tpu.core_type<tc>} {
    %c0 = arith.constant 0 : index
    %c0_0 = arith.constant 0 : index
    %0 = vector.load %arg0[%c0, %c0_0] : memref<3x256xf32, #tpu.memory_space<vmem>>, vector<3x256xf32>
    %c0_1 = arith.constant 0 : index
    %c0_2 = arith.constant 0 : index
    %1 = vector.load %arg2[%c0_1, %c0_2] : memref<552x128xf32, #tpu.memory_space<vmem>>, vector<64x3xf32>
    %c0_3 = arith.constant 0 : index
    %c0_4 = arith.constant 0 : index
    %2 = vector.load %arg3[%c0_3, %c0_4] : memref<616x256xf32, #tpu.memory_space<vmem>>, vector<64x256xf32>
    %3 = vector.extract_strided_slice %1 {offsets = [0, 0], sizes = [64, 1], strides = [1, 1]} : vector<64x3xf32> to vector<64x1xf32>
    %4 = vector.extract_strided_slice %0 {offsets = [0, 0], sizes = [1, 256], strides = [1, 1]} : vector<3x256xf32> to vector<1x256xf32>
    %5 = vector.broadcast %3 : vector<64x1xf32> to vector<64x256xf32>
    %6 = vector.broadcast %4 : vector<1x256xf32> to vector<64x256xf32>
    %7 = arith.mulf %5, %6 : vector<64x256xf32>
    %8 = arith.addf %2, %7 : vector<64x256xf32>
    %9 = vector.extract_strided_slice %1 {offsets = [0, 1], sizes = [64, 1], strides = [1, 1]} : vector<64x3xf32> to vector<64x1xf32>
    %10 = vector.extract_strided_slice %0 {offsets = [1, 0], sizes = [1, 256], strides = [1, 1]} : vector<3x256xf32> to vector<1x256xf32>
    %11 = vector.broadcast %9 : vector<64x1xf32> to vector<64x256xf32>
    %12 = vector.broadcast %10 : vector<1x256xf32> to vector<64x256xf32>
    %13 = arith.mulf %11, %12 : vector<64x256xf32>
    %14 = arith.addf %8, %13 : vector<64x256xf32>
    %15 = vector.extract_strided_slice %1 {offsets = [0, 2], sizes = [64, 1], strides = [1, 1]} : vector<64x3xf32> to vector<64x1xf32>
    %16 = vector.extract_strided_slice %0 {offsets = [2, 0], sizes = [1, 256], strides = [1, 1]} : vector<3x256xf32> to vector<1x256xf32>
    %17 = vector.broadcast %15 : vector<64x1xf32> to vector<64x256xf32>
    %18 = vector.broadcast %16 : vector<1x256xf32> to vector<64x256xf32>
    %19 = arith.mulf %17, %18 : vector<64x256xf32>
    %20 = arith.addf %14, %19 : vector<64x256xf32>
    %cst = arith.constant 0.000000e+00 : f32
    %21 = vector.broadcast %cst : f32 to vector<64x256xf32>
    %22 = arith.maximumf %20, %21 : vector<64x256xf32>
    %c64 = arith.constant 64 : index
    %c0_5 = arith.constant 0 : index
    %23 = vector.load %arg2[%c64, %c0_5] : memref<552x128xf32, #tpu.memory_space<vmem>>, vector<128x64xf32>
    %cst_6 = arith.constant dense<0.000000e+00> : vector<128x256xf32>
    %24 = tpu.matmul %23, %22, %cst_6 {dimension_numbers = #tpu.dot_dimension_numbers<[1], [0], [0], [1], [0, 0, 1, 1], [], []>} : vector<128x64xf32>, vector<64x256xf32>, vector<128x256xf32> -> vector<128x256xf32>
    %c64_7 = arith.constant 64 : index
    %c0_8 = arith.constant 0 : index
    %25 = vector.load %arg3[%c64_7, %c0_8] : memref<616x256xf32, #tpu.memory_space<vmem>>, vector<128x256xf32>
    %26 = arith.addf %24, %25 : vector<128x256xf32>
    %cst_9 = arith.constant 0.000000e+00 : f32
    %27 = vector.broadcast %cst_9 : f32 to vector<128x256xf32>
    %28 = arith.maximumf %26, %27 : vector<128x256xf32>
    %c192 = arith.constant 192 : index
    %c0_10 = arith.constant 0 : index
    %29 = vector.load %arg2[%c192, %c0_10] : memref<552x128xf32, #tpu.memory_space<vmem>>, vector<32x128xf32>
    %cst_11 = arith.constant dense<0.000000e+00> : vector<32x256xf32>
    %30 = tpu.matmul %29, %28, %cst_11 {dimension_numbers = #tpu.dot_dimension_numbers<[1], [0], [0], [1], [0, 0, 1, 1], [], []>} : vector<32x128xf32>, vector<128x256xf32>, vector<32x256xf32> -> vector<32x256xf32>
    %c192_12 = arith.constant 192 : index
    %c0_13 = arith.constant 0 : index
    %31 = vector.load %arg3[%c192_12, %c0_13] : memref<616x256xf32, #tpu.memory_space<vmem>>, vector<32x256xf32>
    %32 = arith.addf %30, %31 : vector<32x256xf32>
    %33 = vector.extract_strided_slice %32 {offsets = [0, 0], sizes = [32, 128], strides = [1, 1]} : vector<32x256xf32> to vector<32x128xf32>
    %cst_14 = arith.constant dense<0xFF800000> : vector<32xf32>
    %34 = vector.multi_reduction <maximumf>, %33, %cst_14 [1] : vector<32x128xf32> to vector<32xf32>
    %35 = vector.shape_cast %34 : vector<32xf32> to vector<32x1xf32>
    %36 = vector.extract_strided_slice %32 {offsets = [0, 128], sizes = [32, 128], strides = [1, 1]} : vector<32x256xf32> to vector<32x128xf32>
    %cst_15 = arith.constant dense<0xFF800000> : vector<32xf32>
    %37 = vector.multi_reduction <maximumf>, %36, %cst_15 [1] : vector<32x128xf32> to vector<32xf32>
    %38 = vector.shape_cast %37 : vector<32xf32> to vector<32x1xf32>
    %39 = tpu.concatenate %35, %38 in 1 : vector<32x1xf32>, vector<32x1xf32> -> vector<32x2xf32>
    %c224 = arith.constant 224 : index
    %c0_16 = arith.constant 0 : index
    %40 = vector.load %arg2[%c224, %c0_16] : memref<552x128xf32, #tpu.memory_space<vmem>>, vector<32x32xf32>
    %cst_17 = arith.constant dense<0.000000e+00> : vector<32x2xf32>
    %41 = tpu.matmul %40, %39, %cst_17 {dimension_numbers = #tpu.dot_dimension_numbers<[1], [0], [0], [1], [0, 0, 1, 1], [], []>} : vector<32x32xf32>, vector<32x2xf32>, vector<32x2xf32> -> vector<32x2xf32>
    %c224_18 = arith.constant 224 : index
    %c0_19 = arith.constant 0 : index
    %42 = vector.load %arg3[%c224_18, %c0_19] : memref<616x256xf32, #tpu.memory_space<vmem>>, vector<32x2xf32>
    %43 = arith.addf %41, %42 : vector<32x2xf32>
    %cst_20 = arith.constant 0.000000e+00 : f32
    %44 = vector.broadcast %cst_20 : f32 to vector<32x2xf32>
    %45 = arith.maximumf %43, %44 : vector<32x2xf32>
    %c256 = arith.constant 256 : index
    %c0_21 = arith.constant 0 : index
    %46 = vector.load %arg2[%c256, %c0_21] : memref<552x128xf32, #tpu.memory_space<vmem>>, vector<32x32xf32>
    %cst_22 = arith.constant dense<0.000000e+00> : vector<32x2xf32>
    %47 = tpu.matmul %46, %45, %cst_22 {dimension_numbers = #tpu.dot_dimension_numbers<[1], [0], [0], [1], [0, 0, 1, 1], [], []>} : vector<32x32xf32>, vector<32x2xf32>, vector<32x2xf32> -> vector<32x2xf32>
    %c256_23 = arith.constant 256 : index
    %c0_24 = arith.constant 0 : index
    %48 = vector.load %arg3[%c256_23, %c0_24] : memref<616x256xf32, #tpu.memory_space<vmem>>, vector<32x2xf32>
    %49 = arith.addf %47, %48 : vector<32x2xf32>
    %cst_25 = arith.constant 0.000000e+00 : f32
    %50 = vector.broadcast %cst_25 : f32 to vector<32x2xf32>
    %51 = arith.maximumf %49, %50 : vector<32x2xf32>
    %52 = vector.extract_strided_slice %51 {offsets = [0, 0], sizes = [32, 1], strides = [1, 1]} : vector<32x2xf32> to vector<32x1xf32>
    %53 = vector.shape_cast %52 : vector<32x1xf32> to vector<32x1xf32>
    %54 = vector.broadcast %53 : vector<32x1xf32> to vector<32x64xf32>
    %55 = vector.extract_strided_slice %51 {offsets = [0, 1], sizes = [32, 1], strides = [1, 1]} : vector<32x2xf32> to vector<32x1xf32>
    %56 = vector.shape_cast %55 : vector<32x1xf32> to vector<32x1xf32>
    %57 = vector.broadcast %56 : vector<32x1xf32> to vector<32x64xf32>
    %58 = tpu.concatenate %54, %57 in 1 : vector<32x64xf32>, vector<32x64xf32> -> vector<32x128xf32>
    %59 = tpu.concatenate %58, %58 in 0 : vector<32x128xf32>, vector<32x128xf32> -> vector<64x128xf32>
    %c352 = arith.constant 352 : index
    %c0_26 = arith.constant 0 : index
    %60 = vector.load %arg3[%c352, %c0_26] : memref<616x256xf32, #tpu.memory_space<vmem>>, vector<64x128xf32>
    %61 = arith.mulf %59, %60 : vector<64x128xf32>
    %c0_27 = arith.constant 0 : index
    %c0_28 = arith.constant 0 : index
    %62 = vector.load %arg1[%c0_27, %c0_28] : memref<4x128xf32, #tpu.memory_space<vmem>>, vector<4x128xf32>
    %c288 = arith.constant 288 : index
    %c0_29 = arith.constant 0 : index
    %63 = vector.load %arg2[%c288, %c0_29] : memref<552x128xf32, #tpu.memory_space<vmem>>, vector<64x4xf32>
    %c288_30 = arith.constant 288 : index
    %c0_31 = arith.constant 0 : index
    %64 = vector.load %arg3[%c288_30, %c0_31] : memref<616x256xf32, #tpu.memory_space<vmem>>, vector<64x128xf32>
    %65 = arith.addf %64, %61 : vector<64x128xf32>
    %66 = vector.extract_strided_slice %63 {offsets = [0, 0], sizes = [64, 1], strides = [1, 1]} : vector<64x4xf32> to vector<64x1xf32>
    %67 = vector.extract_strided_slice %62 {offsets = [0, 0], sizes = [1, 128], strides = [1, 1]} : vector<4x128xf32> to vector<1x128xf32>
    %68 = vector.broadcast %66 : vector<64x1xf32> to vector<64x128xf32>
    %69 = vector.broadcast %67 : vector<1x128xf32> to vector<64x128xf32>
    %70 = arith.mulf %68, %69 : vector<64x128xf32>
    %71 = arith.addf %65, %70 : vector<64x128xf32>
    %72 = vector.extract_strided_slice %63 {offsets = [0, 1], sizes = [64, 1], strides = [1, 1]} : vector<64x4xf32> to vector<64x1xf32>
    %73 = vector.extract_strided_slice %62 {offsets = [1, 0], sizes = [1, 128], strides = [1, 1]} : vector<4x128xf32> to vector<1x128xf32>
    %74 = vector.broadcast %72 : vector<64x1xf32> to vector<64x128xf32>
    %75 = vector.broadcast %73 : vector<1x128xf32> to vector<64x128xf32>
    %76 = arith.mulf %74, %75 : vector<64x128xf32>
    %77 = arith.addf %71, %76 : vector<64x128xf32>
    %78 = vector.extract_strided_slice %63 {offsets = [0, 2], sizes = [64, 1], strides = [1, 1]} : vector<64x4xf32> to vector<64x1xf32>
    %79 = vector.extract_strided_slice %62 {offsets = [2, 0], sizes = [1, 128], strides = [1, 1]} : vector<4x128xf32> to vector<1x128xf32>
    %80 = vector.broadcast %78 : vector<64x1xf32> to vector<64x128xf32>
    %81 = vector.broadcast %79 : vector<1x128xf32> to vector<64x128xf32>
    %82 = arith.mulf %80, %81 : vector<64x128xf32>
    %83 = arith.addf %77, %82 : vector<64x128xf32>
    %84 = vector.extract_strided_slice %63 {offsets = [0, 3], sizes = [64, 1], strides = [1, 1]} : vector<64x4xf32> to vector<64x1xf32>
    %85 = vector.extract_strided_slice %62 {offsets = [3, 0], sizes = [1, 128], strides = [1, 1]} : vector<4x128xf32> to vector<1x128xf32>
    %86 = vector.broadcast %84 : vector<64x1xf32> to vector<64x128xf32>
    %87 = vector.broadcast %85 : vector<1x128xf32> to vector<64x128xf32>
    %88 = arith.mulf %86, %87 : vector<64x128xf32>
    %89 = arith.addf %83, %88 : vector<64x128xf32>
    %cst_32 = arith.constant 0.000000e+00 : f32
    %90 = vector.broadcast %cst_32 : f32 to vector<64x128xf32>
    %91 = arith.maximumf %89, %90 : vector<64x128xf32>
    %c352_33 = arith.constant 352 : index
    %c0_34 = arith.constant 0 : index
    %92 = vector.load %arg2[%c352_33, %c0_34] : memref<552x128xf32, #tpu.memory_space<vmem>>, vector<64x64xf32>
    %cst_35 = arith.constant dense<0.000000e+00> : vector<64x128xf32>
    %93 = tpu.matmul %92, %91, %cst_35 {dimension_numbers = #tpu.dot_dimension_numbers<[1], [0], [0], [1], [0, 0, 1, 1], [], []>} : vector<64x64xf32>, vector<64x128xf32>, vector<64x128xf32> -> vector<64x128xf32>
    %c416 = arith.constant 416 : index
    %c0_36 = arith.constant 0 : index
    %94 = vector.load %arg3[%c416, %c0_36] : memref<616x256xf32, #tpu.memory_space<vmem>>, vector<64x128xf32>
    %95 = arith.addf %93, %94 : vector<64x128xf32>
    %cst_37 = arith.constant 0.000000e+00 : f32
    %96 = vector.broadcast %cst_37 : f32 to vector<64x128xf32>
    %97 = arith.maximumf %95, %96 : vector<64x128xf32>
    %c416_38 = arith.constant 416 : index
    %c0_39 = arith.constant 0 : index
    %98 = vector.load %arg2[%c416_38, %c0_39] : memref<552x128xf32, #tpu.memory_space<vmem>>, vector<64x64xf32>
    %cst_40 = arith.constant dense<0.000000e+00> : vector<64x128xf32>
    %99 = tpu.matmul %98, %97, %cst_40 {dimension_numbers = #tpu.dot_dimension_numbers<[1], [0], [0], [1], [0, 0, 1, 1], [], []>} : vector<64x64xf32>, vector<64x128xf32>, vector<64x128xf32> -> vector<64x128xf32>
    %c480 = arith.constant 480 : index
    %c0_41 = arith.constant 0 : index
    %100 = vector.load %arg3[%c480, %c0_41] : memref<616x256xf32, #tpu.memory_space<vmem>>, vector<64x128xf32>
    %101 = arith.addf %99, %100 : vector<64x128xf32>
    %cst_42 = arith.constant 0.000000e+00 : f32
    %102 = vector.broadcast %cst_42 : f32 to vector<64x128xf32>
    %103 = arith.maximumf %101, %102 : vector<64x128xf32>
    %c480_43 = arith.constant 480 : index
    %c0_44 = arith.constant 0 : index
    %104 = vector.load %arg2[%c480_43, %c0_44] : memref<552x128xf32, #tpu.memory_space<vmem>>, vector<64x64xf32>
    %cst_45 = arith.constant dense<0.000000e+00> : vector<64x128xf32>
    %105 = tpu.matmul %104, %103, %cst_45 {dimension_numbers = #tpu.dot_dimension_numbers<[1], [0], [0], [1], [0, 0, 1, 1], [], []>} : vector<64x64xf32>, vector<64x128xf32>, vector<64x128xf32> -> vector<64x128xf32>
    %c544 = arith.constant 544 : index
    %c0_46 = arith.constant 0 : index
    %106 = vector.load %arg3[%c544, %c0_46] : memref<616x256xf32, #tpu.memory_space<vmem>>, vector<64x128xf32>
    %107 = arith.addf %105, %106 : vector<64x128xf32>
    %cst_47 = arith.constant 0.000000e+00 : f32
    %108 = vector.broadcast %cst_47 : f32 to vector<64x128xf32>
    %109 = arith.maximumf %107, %108 : vector<64x128xf32>
    %c544_48 = arith.constant 544 : index
    %c0_49 = arith.constant 0 : index
    %110 = vector.load %arg2[%c544_48, %c0_49] : memref<552x128xf32, #tpu.memory_space<vmem>>, vector<6x64xf32>
    %cst_50 = arith.constant dense<0.000000e+00> : vector<6x128xf32>
    %111 = tpu.matmul %110, %109, %cst_50 {dimension_numbers = #tpu.dot_dimension_numbers<[1], [0], [0], [1], [0, 0, 1, 1], [], []>} : vector<6x64xf32>, vector<64x128xf32>, vector<6x128xf32> -> vector<6x128xf32>
    %c608 = arith.constant 608 : index
    %c0_51 = arith.constant 0 : index
    %112 = vector.load %arg3[%c608, %c0_51] : memref<616x256xf32, #tpu.memory_space<vmem>>, vector<6x128xf32>
    %113 = arith.addf %111, %112 : vector<6x128xf32>
    %c0_52 = arith.constant 0 : index
    %c0_53 = arith.constant 0 : index
    %114 = vector.load %arg4[%c0_52, %c0_53] : memref<6x128xf32, #tpu.memory_space<vmem>>, vector<6x128xf32>
    tpu.vector_store %arg4[%c0_52, %c0_53], %113 {strides = array<i32>} : memref<6x128xf32, #tpu.memory_space<vmem>>, vector<6x128xf32>,
    return
  }
}

</mosaic_0001>

<bundles_post_ra>
// kernel: tpu_custom_call.1
= control target key start
LH: loop header
LB: loop body
LE: loop exit
PB: predicated region body
PF: predicated region fallthrough
CT: control target
= control target key end

     0   :  { %9 = vsyncpa [#allocation3], 0  ;;  %s2814_s0 = inlined_call_operand.hbm [shape: f32[3,256], index: 0, kind: input, shape index: {}]   ;;  %s2815_s1 = inlined_call_operand.hbm [shape: f32[4,128], index: 1, kind: input, shape index: {}]   ;;  %s2816_s2 = inlined_call_operand.hbm [shape: f32[552,128], index: 2, kind: input, shape index: {}]   ;;  %s2817_s3 = inlined_call_operand.hbm [shape: f32[616,256], index: 3, kind: input, shape index: {}]   ;;  %s2818_s4 = inlined_call_operand.hbm [shape: f32[6,128], index: 4, kind: output, shape index: {}]  }
   0x1   :  { %10 = vsyncpa [#allocation6], 0 }
   0x2   :  { %11 = vsyncpa [#allocation9], 0 }
   0x3   :  { %12 = vsyncpa [#allocation4], 0  ;;  %s2406_s15 = smov [#allocation5]   ;;  %s2407_s17 = smov [#allocation2]  }
   0x4   :  { %s29_s16 = sshll.u32 %s2406_s15, 4  ;;  %s19_s18 = sshll.u32 %s2407_s17, 4  ;;  %s30_s16 = int_to_ptr.vmem [resolvable:$true] %s29_s16  ;;  %s20_s18 = int_to_ptr.vmem [resolvable:$true] %s19_s18 }
   0x5   :  { %s2288_s21 = scalar_lea.hbm %s2815_s1, 64 }
   0x6   :  { %p2289_p0 = scmp.ne.s32.totalorder %s2815_s1, %s2288_s21  ;;  %p2292_p1 = scmp.lt.u32.totalorder %s2288_s21, %s2815_s1 }
   0x8   :  { %p2294_p2 = pnand %p2292_p1, %p2289_p0 }
   0xa   :  { %2297 = shalt.err (!%p2294_p2)
}
   0xb   :  { %s2298_s26 = scalar_lea.vmem %s30_s16, 64  ;;  %p2303_p4 = scmp.lt.s32.totalorder %s30_s16, %s30_s16 }
   0xc   :  { %p2299_p3 = scmp.ne.s32.totalorder %s30_s16, %s2298_s26  ;;  %p2304_p5 = scmp.lt.s32.totalorder %s2298_s26, %s2298_s26 }
   0xe   :  { %p2305_p6 = por %p2304_p5, %p2303_p4 }
  0x10   :  { %p2306_p7 = pnand %p2305_p6, %p2299_p3 }
  0x12   :  { %2309 = shalt.err (!%p2306_p7)
}
  0x13   :  { %32 = dma.hbm_to_vmem [thread:$0]  %s2815_s1, 64, %s30_s16, [#allocation6]  }
  0x14   :  { %s2310_s5 = scalar_lea.hbm %s2814_s0, 128 }
  0x15   :  { %p2311_p8 = scmp.ne.s32.totalorder %s2814_s0, %s2310_s5  ;;  %p2314_p9 = scmp.lt.u32.totalorder %s2310_s5, %s2814_s0 }
  0x17   :  { %p2316_p10 = pnand %p2314_p9, %p2311_p8 }
  0x19   :  { %2319 = shalt.err (!%p2316_p10)
}
  0x1a   :  { %s2320_s10 = scalar_lea.vmem %s20_s18, 128  ;;  %p2325_p12 = scmp.lt.s32.totalorder %s20_s18, %s20_s18 }
  0x1b   :  { %p2321_p11 = scmp.ne.s32.totalorder %s20_s18, %s2320_s10  ;;  %p2326_p13 = scmp.lt.s32.totalorder %s2320_s10, %s2320_s10 }
  0x1d   :  { %p2327_p0 = por %p2326_p13, %p2325_p12 }
  0x1f   :  { %p2328_p1 = pnand %p2327_p0, %p2321_p11 }
  0x21   :  { %2331 = shalt.err (!%p2328_p1)
}
  0x22   :  { %22 = dma.hbm_to_vmem [thread:$0]  %s2814_s0, 128, %s20_s18, [#allocation3]  }
  0x23   :  { %s2408_s12 = smov [#allocation7]   ;;  %s2332_s16 = scalar_lea.hbm %s2816_s2, 8832 }
  0x24   :  { %s38_s13 = sshll.u32 %s2408_s12, 4  ;;  %p2333_p2 = scmp.ne.s32.totalorder %s2816_s2, %s2332_s16  ;;  %s39_s13 = int_to_ptr.vmem [resolvable:$true] %s38_s13 }
  0x25   :  { %p2336_p3 = scmp.lt.u32.totalorder %s2332_s16, %s2816_s2 }
  0x27   :  { %p2338_p4 = pnand %p2336_p3, %p2333_p2 }
  0x29   :  { %2341 = shalt.err (!%p2338_p4)
}
  0x2a   :  { %s2342_s22 = scalar_lea.vmem %s39_s13, 8832  ;;  %p2347_p6 = scmp.lt.s32.totalorder %s39_s13, %s39_s13 }
  0x2b   :  { %p2343_p5 = scmp.ne.s32.totalorder %s39_s13, %s2342_s22  ;;  %p2348_p7 = scmp.lt.s32.totalorder %s2342_s22, %s2342_s22 }
  0x2d   :  { %p2349_p8 = por %p2348_p7, %p2347_p6 }
  0x2f   :  { %p2350_p9 = pnand %p2349_p8, %p2343_p5 }
  0x31   :  { %2353 = shalt.err (!%p2350_p9)
}
  0x32   :  { %s2409_s0 = smov 128   ;;  %s2410_s18 = smov 8  }
  0x33   :  { %44 = dma.hbm_to_vmem [thread:$0]  %s2816_s2, 8832, %s39_s13, [#allocation6], %s2409_s0, %s2409_s0, %s2410_s18  }
  0x34   :  { %s2411_s25 = smov [#allocation8]   ;;  %s2354_s29 = scalar_lea.hbm %s2817_s3, 19712 }
  0x35   :  { %s50_s26 = sshll.u32 %s2411_s25, 4  ;;  %p2355_p10 = scmp.ne.s32.totalorder %s2817_s3, %s2354_s29  ;;  %s51_s26 = int_to_ptr.vmem [resolvable:$true] %s50_s26 }
  0x36   :  { %p2358_p11 = scmp.lt.u32.totalorder %s2354_s29, %s2817_s3 }
  0x38   :  { %p2360_p12 = pnand %p2358_p11, %p2355_p10 }
  0x3a   :  { %2363 = shalt.err (!%p2360_p12)
}
  0x3b   :  { %s2364_s8 = scalar_lea.vmem %s51_s26, 19712  ;;  %p2369_p0 = scmp.lt.s32.totalorder %s51_s26, %s51_s26 }
  0x3c   :  { %p2365_p13 = scmp.ne.s32.totalorder %s51_s26, %s2364_s8  ;;  %p2370_p1 = scmp.lt.s32.totalorder %s2364_s8, %s2364_s8 }
  0x3e   :  { %p2371_p2 = por %p2370_p1, %p2369_p0 }
  0x40   :  { %p2372_p3 = pnand %p2371_p2, %p2365_p13 }
  0x42   :  { %2375 = shalt.err (!%p2372_p3)
}
  0x43   :  { %s2412_s2 = smov 256   ;;  %s2413_s9 = smov 16  }
  0x44   :  { %56 = dma.hbm_to_vmem [thread:$0]  %s2817_s3, 19712, %s51_s26, [#allocation9], %s2412_s2, %s2412_s2, %s2413_s9  }
  0x45   :  { %2398 = dma.done.wait [#allocation3], 128  }
  0x46   :  { %2399 = vsyncadd [#allocation3], 4294967168 }
  0x47   :  { %2400 = dma.done.wait [#allocation6], 8896  }
  0x48   :  { %2401 = vsyncadd [#allocation6], 4294958400 }
  0x49   :  { %2402 = dma.done.wait [#allocation9], 19712  }
  0x4a   :  { %2403 = vsyncadd [#allocation9], 4294947584  ;;  %v2414_v0 = vmov 1   ;;  %v2415_v1 = vmov 0   ;;  %v70_v2 = vld [vmem:[#allocation7] sm:$0xff]  ;;  %v71_v3 = vld [vmem:[#allocation7 + $0x8] sm:$0xff]  ;;  %v135_v12 = vlaneseq }
  0x4b   :  { %2247 = vset.pattern.permute.xlu1 %v2414_v0  ;;  %2246 = vset.pattern.permute.xlu0 %v2415_v1  ;;  %v72_v4 = vld [vmem:[#allocation7 + $0x10] sm:$0xff]  ;;  %v73_v5 = vld [vmem:[#allocation7 + $0x18] sm:$0xff]  ;;  %v2416_v6 = vmov 2   ;;  %v74_v7 = vld [vmem:[#allocation7 + $0x20] sm:$0xff]  ;;  %v2417_v11 = vmov 0.0   ;;  %vm413_vm0 = vcmask 523264  }
  0x4c   :  { %186 = vperm.xlu1 %2247, %v70_v2   ;;  %96 = vperm.xlu0 %2246, %v70_v2   ;;  %v75_v8 = vld [vmem:[#allocation7 + $0x28] sm:$0xff]  ;;  %v77_v9 = vld [vmem:[#allocation7 + $0x38] sm:$0xff]  ;;  %v76_v10 = vld [vmem:[#allocation7 + $0x30] sm:$0xff]  ;;  %v2512_v13 = vshrl.u32 %v135_v12, 7  ;;  %vm785_vm1 = vcmask 261120   ;;  %vm772_vm2 = vcmask 7168  }
  0x4d   :  { %526 = vmatprep.mubr.f32.mxu0 %v2417_v11  ;;  %731 = vmatprep.mubr.f32.mxu1 %v2417_v11  ;;  %v69_v16 = vld [vmem:[#allocation2] sm:$0x77]  ;;  %v78_v35 = vld [vmem:[#allocation8] sm:$0xff]  ;;  %v81_v42 = vld [vmem:[#allocation8 + $0x18] sm:$0xff]  ;;  %vm2420_vm3 = vmmov 0   ;;  %s2421_s3 = smov [#allocation10]  }
  0x4e   :  { %v2515_v14 = vsub.s32 0, %v2512_v13  ;;  %v141_v15 = vsub.s32 4, %v2512_v13  ;;  %v2520_v19 = vsub.s32 1, %v2512_v13  ;;  %v223_v20 = vsub.s32 5, %v2512_v13  ;;  %v79_v36 = vld [vmem:[#allocation8 + $0x8] sm:$0xff]  ;;  %v80_v41 = vld [vmem:[#allocation8 + $0x10] sm:$0xff] }
  0x4f   :  { %v2530_v25 = vsub.s32 2, %v2512_v13  ;;  %v305_v26 = vsub.s32 6, %v2512_v13  ;;  %s1842_s11 = sshll.u32 %s2421_s3, 4  ;;  %s1843_s11 = int_to_ptr.vmem [resolvable:$true] %s1842_s11 }
  0x50   :  { %190 = vperm.xlu1 %2247, %v71_v3   ;;  %101 = vperm.xlu0 %2246, %v71_v3   ;;  %v138_v17 = vrot.slane %v69_v16, %v2515_v14  ;;  %v142_v18 = vrot.slane %v69_v16, %v141_v15  ;;  %v220_v27 = vrot.slane %v69_v16, %v2520_v19  ;;  %s2376_s12 = scalar_lea.vmem %s1843_s11, 128  ;;  %p2381_p5 = scmp.lt.s32.totalorder %s1843_s11, %s1843_s11 }
  0x51   :  { %v224_v28 = vrot.slane %v69_v16, %v223_v20  ;;  %v302_v33 = vrot.slane %v69_v16, %v2530_v25  ;;  %v306_v34 = vrot.slane %v69_v16, %v305_v26  ;;  %v82_v26 = vld [vmem:[#allocation8 + $0x20] sm:$0xff]  ;;  %p2377_p4 = scmp.ne.s32.totalorder %s1843_s11, %s2376_s12  ;;  %p2382_p6 = scmp.lt.s32.totalorder %s2376_s12, %s2376_s12 }
  0x52   :  { %v2524_v23 = vrot.slane %v138_v17, %v2515_v14  ;;  %v2527_v24 = vrot.slane %v142_v18, %v2515_v14  ;;  %v2540_v39 = vrot.slane %v220_v27, %v2520_v19  ;;  %v83_v27 = vld [vmem:[#allocation8 + $0x28] sm:$0xff] }
  0x53   :  { %v2543_v40 = vrot.slane %v224_v28, %v2520_v19  ;;  %v2546_v47 = vrot.slane %v302_v33, %v2530_v25  ;;  %v2549_v48 = vrot.slane %v306_v34, %v2530_v25  ;;  %p2383_p7 = por %p2382_p6, %p2381_p5 }
  0x54   :  { %2248 = vset.pattern.permute.xlu1 %v2415_v1  ;;  %106 = vperm.xlu0 %2246, %v72_v4  }
  0x55   :  { %111 = vperm.xlu1 %2248, %v73_v5   ;;  %p2384_p8 = pnand %p2383_p7, %p2377_p4 }
  0x58   :  { %2249 = vset.pattern.permute.xlu0 %v2416_v6 }
  0x59   :  { %2250 = vset.pattern.permute.xlu1 %v2416_v6  ;;  %268 = vperm.xlu0 %2249, %v70_v2  }
  0x5a   :  { %272 = vperm.xlu1 %2250, %v71_v3  }
  0x5d   :  { %276 = vperm.xlu0 %2249, %v72_v4  }
  0x5e   :  { %2251 = vset.pattern.permute.xlu1 %v2414_v0 }
  0x5f   :  { %194 = vperm.xlu1 %2251, %v72_v4  }
  0x61   :  { %284 = vperm.xlu0 %2249, %v74_v7  }
  0x63   :  { %2252 = vset.pattern.permute.xlu1 %v2415_v1 }
  0x64   :  { %116 = vperm.xlu1 %2252, %v74_v7  }
  0x65   :  { %2256 = vset.pattern.permute.xlu0 %v2414_v0 }
  0x66   :  { %198 = vperm.xlu0 %2256, %v73_v5  }
  0x68   :  { %121 = vperm.xlu1 %2252, %v75_v8  }
  0x6a   :  { %206 = vperm.xlu0 %2256, %v75_v8  }
  0x6c   :  { %2253 = vset.pattern.permute.xlu1 %v2416_v6 }
  0x6d   :  { %280 = vperm.xlu1 %2253, %v73_v5  }
  0x6e   :  { %214 = vperm.xlu0 %2256, %v77_v9  }
  0x71   :  { %2254 = vset.pattern.permute.xlu1 %v2414_v0 }
  0x72   :  { %202 = vperm.xlu1 %2254, %v74_v7  }
  0x76   :  { %2255 = vset.pattern.permute.xlu1 %v2415_v1 }
  0x77   :  { %126 = vperm.xlu1 %2255, %v76_v10  }
  0x7b   :  { %131 = vperm.xlu1 %2255, %v77_v9  }
  0x7f   :  { %2257 = vset.pattern.permute.xlu1 %v2416_v6 }
  0x80   :  { %288 = vperm.xlu1 %2257, %v75_v8  }
  0x84   :  { %2258 = vset.pattern.permute.xlu1 %v2414_v0 }
  0x85   :  { %210 = vperm.xlu1 %2258, %v76_v10  }
  0x89   :  { %2259 = vset.pattern.permute.xlu1 %v2416_v6 }
  0x8a   :  { %292 = vperm.xlu1 %2259, %v76_v10  }
  0x8e   :  { %296 = vperm.xlu1 %2259, %v77_v9  }
  0x92   :  { %2260 = vset.pattern.permute.xlu1 %v2415_v1 }
  0xcb   :  { %v187_v21 = vpop.permute.xlu1 %186  ;;  %v97_v22 = vpop.permute.xlu0 %96 }
  0xcc   :  { %v153_v31 = vmul.f32 %v2524_v23, %v97_v22  ;;  %v154_v32 = vmul.f32 %v2527_v24, %v97_v22  ;;  %v235_v51 = vmul.f32 %v2540_v39, %v187_v21  ;;  %v236_v52 = vmul.f32 %v2543_v40, %v187_v21 }
  0xce   :  { %v169_v45 = vadd.f32 %v153_v31, %v78_v35  ;;  %v170_v46 = vadd.f32 %v154_v32, %v79_v36 }
  0xcf   :  { %v191_v29 = vpop.permute.xlu1 %190  ;;  %v102_v30 = vpop.permute.xlu0 %101 }
  0xd0   :  { %v155_v37 = vmul.f32 %v2524_v23, %v102_v30  ;;  %v156_v38 = vmul.f32 %v2527_v24, %v102_v30  ;;  %v237_v53 = vmul.f32 %v2540_v39, %v191_v29  ;;  %v238_v54 = vmul.f32 %v2543_v40, %v191_v29 }
  0xd1   :  { %v251_v56 = vadd.f32 %v235_v51, %v169_v45  ;;  %v252_v60 = vadd.f32 %v236_v52, %v170_v46 }
  0xd2   :  { %v171_v49 = vadd.f32 %v155_v37, %v80_v41  ;;  %v172_v50 = vadd.f32 %v156_v38, %v81_v42  ;;  %v84_v37 = vld [vmem:[#allocation8 + $0x30] sm:$0xff]  ;;  %v85_v38 = vld [vmem:[#allocation8 + $0x38] sm:$0xff] }
  0xd3   :  { %v107_v43 = vpop.permute.xlu0 %106 }
  0xd4   :  { %v112_v44 = vpop.permute.xlu1 %111  ;;  %v253_v61 = vadd.f32 %v237_v53, %v171_v49  ;;  %v254_v2 = vadd.f32 %v238_v54, %v172_v50  ;;  %v157_v17 = vmul.f32 %v2524_v23, %v107_v43  ;;  %v158_v18 = vmul.f32 %v2527_v24, %v107_v43 }
  0xd5   :  { %v159_v34 = vmul.f32 %v2524_v23, %v112_v44  ;;  %v160_v35 = vmul.f32 %v2527_v24, %v112_v44 }
  0xd6   :  { %v173_v29 = vadd.f32 %v157_v17, %v82_v26  ;;  %v174_v30 = vadd.f32 %v158_v18, %v83_v27  ;;  %v89_v17 = vld [vmem:[#allocation8 + $0x58] sm:$0xff] }
  0xd7   :  { %v175_v50 = vadd.f32 %v159_v34, %v84_v37  ;;  %v176_v51 = vadd.f32 %v160_v35, %v85_v38 }
  0xd8   :  { %v269_v55 = vpop.permute.xlu0 %268 }
  0xd9   :  { %v317_v57 = vmul.f32 %v2546_v47, %v269_v55  ;;  %v318_v58 = vmul.f32 %v2549_v48, %v269_v55  ;;  %v273_v59 = vpop.permute.xlu1 %272 }
  0xda   :  { %v319_v62 = vmul.f32 %v2546_v47, %v273_v59  ;;  %v320_v63 = vmul.f32 %v2549_v48, %v273_v59 }
  0xdb   :  { %v333_v3 = vadd.f32 %v317_v57, %v251_v56  ;;  %v334_v4 = vadd.f32 %v318_v58, %v252_v60 }
  0xdc   :  { %v335_v5 = vadd.f32 %v319_v62, %v253_v61  ;;  %v277_v7 = vpop.permute.xlu0 %276  ;;  %v336_v8 = vadd.f32 %v320_v63, %v254_v2 }
  0xdd   :  { %v350_v9 = vmax.f32 %v334_v4, 0.0  ;;  %v349_v10 = vmax.f32 %v333_v3, 0.0  ;;  %v321_v41 = vmul.f32 %v2546_v47, %v277_v7  ;;  %v322_v42 = vmul.f32 %v2549_v48, %v277_v7 }
  0xde   :  { %v195_v12 = vpop.permute.xlu1 %194  ;;  %v352_v15 = vmax.f32 %v336_v8, 0.0  ;;  %v351_v16 = vmax.f32 %v335_v5, 0.0 }
  0xdf   :  { %v239_v31 = vmul.f32 %v2540_v39, %v195_v12  ;;  %v240_v32 = vmul.f32 %v2543_v40, %v195_v12 }
  0xe0   :  { %v2561_v20 = vpop.permute.xlu0 %284  ;;  %v2106_v21 = vpack.c.bf16 %v352_v15, %v350_v9  ;;  %v2108_v22 = vpack.c.bf16 %v351_v16, %v349_v10  ;;  %v86_v9 = vld [vmem:[#allocation8 + $0x40] sm:$0xff]  ;;  %v87_v10 = vld [vmem:[#allocation8 + $0x48] sm:$0xff]  ;;  %v88_v16 = vld [vmem:[#allocation8 + $0x50] sm:$0xff] }
  0xe1   :  { %v255_v43 = vadd.f32 %v239_v31, %v173_v29  ;;  %v256_v45 = vadd.f32 %v240_v32, %v174_v30  ;;  %v326_v34 = vmul.f32 %v2549_v48, %v2561_v20 }
  0xe2   :  { %2107 = vmatprep.subr.bf16.mxu0 %v2106_v21 }
  0xe3   :  { %v117_v28 = vpop.permute.xlu1 %116  ;;  %2109 = vmatpush1.bf16.msra.mxu0 %v2108_v22  ;;  %v337_v52 = vadd.f32 %v321_v41, %v255_v43  ;;  %v338_v53 = vadd.f32 %v322_v42, %v256_v45 }
  0xe4   :  { %v161_v5 = vmul.f32 %v2524_v23, %v117_v28  ;;  %v162_v7 = vmul.f32 %v2527_v24, %v117_v28 }
  0xe5   :  { %v199_v33 = vpop.permute.xlu0 %198  ;;  %v354_v63 = vmax.f32 %v338_v53, 0.0  ;;  %v353_v2 = vmax.f32 %v337_v52, 0.0 }
  0xe6   :  { %v241_v46 = vmul.f32 %v2540_v39, %v199_v33  ;;  %v242_v49 = vmul.f32 %v2543_v40, %v199_v33  ;;  %v177_v26 = vadd.f32 %v161_v5, %v86_v9  ;;  %v178_v27 = vadd.f32 %v162_v7, %v87_v10 }
  0xe7   :  { %v122_v36 = vpop.permute.xlu1 %121  ;;  %v325_v33 = vmul.f32 %v2546_v47, %v2561_v20 }
  0xe8   :  { %v257_v55 = vadd.f32 %v241_v46, %v175_v50  ;;  %v258_v44 = vadd.f32 %v242_v49, %v176_v51  ;;  %v163_v12 = vmul.f32 %v2524_v23, %v122_v36  ;;  %v164_v15 = vmul.f32 %v2527_v24, %v122_v36 }
  0xe9   :  { %v207_v18 = vpop.permute.xlu0 %206 }
  0xea   :  { %v179_v30 = vadd.f32 %v163_v12, %v88_v16  ;;  %v180_v28 = vadd.f32 %v164_v15, %v89_v17  ;;  %v245_v31 = vmul.f32 %v2540_v39, %v207_v18  ;;  %v246_v32 = vmul.f32 %v2543_v40, %v207_v18 }
  0xec   :  { %v281_v54 = vpop.permute.xlu1 %280  ;;  %v261_v37 = vadd.f32 %v245_v31, %v179_v30  ;;  %v262_v38 = vadd.f32 %v246_v32, %v180_v28 }
  0xed   :  { %v323_v56 = vmul.f32 %v2546_v47, %v281_v54  ;;  %v324_v57 = vmul.f32 %v2549_v48, %v281_v54 }
  0xef   :  { %v339_v58 = vadd.f32 %v323_v56, %v257_v55  ;;  %v340_v59 = vadd.f32 %v324_v57, %v258_v44 }
  0xf1   :  { %v355_v60 = vmax.f32 %v339_v58, 0.0  ;;  %v356_v61 = vmax.f32 %v340_v59, 0.0  ;;  %v203_v62 = vpop.permute.xlu1 %202  ;;  %v92_v58 = vld [vmem:[#allocation8 + $0x70] sm:$0xff]  ;;  %v93_v59 = vld [vmem:[#allocation8 + $0x78] sm:$0xff] }
  0xf2   :  { %v243_v21 = vmul.f32 %v2540_v39, %v203_v62  ;;  %v244_v22 = vmul.f32 %v2543_v40, %v203_v62 }
  0xf3   :  { %v2110_v3 = vpack.c.bf16 %v356_v61, %v354_v63  ;;  %v2112_v4 = vpack.c.bf16 %v355_v60, %v353_v2  ;;  %v215_v60 = vpop.permute.xlu0 %214  ;;  %v90_v63 = vld [vmem:[#allocation8 + $0x60] sm:$0xff]  ;;  %v91_v2 = vld [vmem:[#allocation8 + $0x68] sm:$0xff] }
  0xf4   :  { %v259_v35 = vadd.f32 %v243_v21, %v177_v26  ;;  %v260_v36 = vadd.f32 %v244_v22, %v178_v27  ;;  %v249_v9 = vmul.f32 %v2540_v39, %v215_v60 }
  0xf5   :  { %2111 = vmatprep.subr.bf16.mxu0 %v2110_v3 }
  0xf6   :  { %v127_v8 = vpop.permute.xlu1 %126  ;;  %2113 = vmatpush1.bf16.msra.mxu0 %v2112_v4  ;;  %v341_v42 = vadd.f32 %v325_v33, %v259_v35  ;;  %v342_v43 = vadd.f32 %v326_v34, %v260_v36  ;;  %v365_v36 = vld [vmem:[#allocation7 + $0x40] sm:$0xff] }
  0xf7   :  { %v165_v56 = vmul.f32 %v2524_v23, %v127_v8  ;;  %v166_v57 = vmul.f32 %v2527_v24, %v127_v8 }
  0xf8   :  { %v358_v54 = vmax.f32 %v342_v43, 0.0  ;;  %v357_v55 = vmax.f32 %v341_v42, 0.0  ;;  %v371_v42 = vld [vmem:[#allocation7 + $0x70] sm:$0xff]  ;;  %v372_v43 = vld [vmem:[#allocation7 + $0x78] sm:$0xff] }
  0xf9   :  { %v182_v8 = vadd.f32 %v166_v57, %v91_v2  ;;  %v383_v57 = vld [vmem:[#allocation8 + $0x90] sm:$0xff] }
  0xfa   :  { %v132_v29 = vpop.permute.xlu1 %131 }
  0xfb   :  { %v167_v20 = vmul.f32 %v2524_v23, %v132_v29  ;;  %v168_v44 = vmul.f32 %v2527_v24, %v132_v29  ;;  %v250_v23 = vmul.f32 %v2543_v40, %v215_v60  ;;  %v181_v24 = vadd.f32 %v165_v56, %v90_v63 }
  0xfd   :  { %v183_v5 = vadd.f32 %v167_v20, %v92_v58  ;;  %v184_v7 = vadd.f32 %v168_v44, %v93_v59  ;;  %v382_v44 = vld [vmem:[#allocation8 + $0x88] sm:$0xff]  ;;  %v384_v59 = vld [vmem:[#allocation8 + $0x98] sm:$0xff] }
  0xff   :  { %v289_v41 = vpop.permute.xlu1 %288  ;;  %v265_v18 = vadd.f32 %v249_v9, %v183_v5  ;;  %v266_v21 = vadd.f32 %v250_v23, %v184_v7  ;;  %v385_v9 = vld [vmem:[#allocation8 + $0xa0] sm:$0xff] }
 0x100   :  { %v327_v45 = vmul.f32 %v2546_v47, %v289_v41  ;;  %v328_v46 = vmul.f32 %v2549_v48, %v289_v41  ;;  %v370_v41 = vld [vmem:[#allocation7 + $0x68] sm:$0xff] }
 0x102   :  { %v343_v49 = vadd.f32 %v327_v45, %v261_v37  ;;  %v344_v50 = vadd.f32 %v328_v46, %v262_v38  ;;  %v366_v37 = vld [vmem:[#allocation7 + $0x48] sm:$0xff]  ;;  %v369_v38 = vld [vmem:[#allocation7 + $0x60] sm:$0xff] }
 0x103   :  { %v373_v45 = vld [vmem:[#allocation7 + $0x80] sm:$0xff]  ;;  %v374_v46 = vld [vmem:[#allocation7 + $0x88] sm:$0xff] }
 0x104   :  { %v359_v51 = vmax.f32 %v343_v49, 0.0  ;;  %v360_v52 = vmax.f32 %v344_v50, 0.0  ;;  %v211_v53 = vpop.permute.xlu1 %210  ;;  %v375_v49 = vld [vmem:[#allocation7 + $0x90] sm:$0xff]  ;;  %v376_v50 = vld [vmem:[#allocation7 + $0x98] sm:$0xff] }
 0x105   :  { %v247_v3 = vmul.f32 %v2540_v39, %v211_v53  ;;  %v248_v4 = vmul.f32 %v2543_v40, %v211_v53  ;;  %v379_v53 = vld [vmem:[#allocation7 + $0xb0] sm:$0xff] }
 0x106   :  { %v2114_v61 = vpack.c.bf16 %v360_v52, %v358_v54  ;;  %v2116_v62 = vpack.c.bf16 %v359_v51, %v357_v55  ;;  %v377_v51 = vld [vmem:[#allocation7 + $0xa0] sm:$0xff]  ;;  %v378_v52 = vld [vmem:[#allocation7 + $0xa8] sm:$0xff]  ;;  %v380_v54 = vld [vmem:[#allocation7 + $0xb8] sm:$0xff] }
 0x107   :  { %v263_v16 = vadd.f32 %v247_v3, %v181_v24  ;;  %v264_v17 = vadd.f32 %v248_v4, %v182_v8  ;;  %v381_v55 = vld [vmem:[#allocation8 + $0x80] sm:$0xff] }
 0x108   :  { %2115 = vmatprep.subr.bf16.mxu0 %v2114_v61 }
 0x109   :  { %v293_v10 = vpop.permute.xlu1 %292  ;;  %2117 = vmatpush1.bf16.msra.mxu0 %v2116_v62 }
 0x10a   :  { %v329_v12 = vmul.f32 %v2546_v47, %v293_v10  ;;  %v330_v15 = vmul.f32 %v2549_v48, %v293_v10  ;;  %v386_v10 = vld [vmem:[#allocation8 + $0xa8] sm:$0xff] }
 0x10c   :  { %v345_v26 = vadd.f32 %v329_v12, %v263_v16  ;;  %v346_v27 = vadd.f32 %v330_v15, %v264_v17  ;;  %v387_v12 = vld [vmem:[#allocation8 + $0xb0] sm:$0xff]  ;;  %v388_v17 = vld [vmem:[#allocation8 + $0xb8] sm:$0xff] }
 0x10d   :  { %v297_v22 = vpop.permute.xlu1 %296 }
 0x10e   :  { %v331_v29 = vmul.f32 %v2546_v47, %v297_v22  ;;  %v332_v39 = vmul.f32 %v2549_v48, %v297_v22  ;;  %v361_v28 = vmax.f32 %v345_v26, 0.0  ;;  %v362_v31 = vmax.f32 %v346_v27, 0.0  ;;  %v367_v47 = vld [vmem:[#allocation7 + $0x50] sm:$0xff]  ;;  %v368_v48 = vld [vmem:[#allocation7 + $0x58] sm:$0xff] }
 0x110   :  { %v347_v40 = vadd.f32 %v331_v29, %v265_v18  ;;  %v348_v30 = vadd.f32 %v332_v39, %v266_v21 }
 0x112   :  { %v363_v32 = vmax.f32 %v347_v40, 0.0  ;;  %v364_v33 = vmax.f32 %v348_v30, 0.0 }
 0x114   :  { %v2118_v34 = vpack.c.bf16 %v364_v33, %v362_v31  ;;  %v2120_v35 = vpack.c.bf16 %v363_v32, %v361_v28  ;;  %v389_v28 = vld [vmem:[#allocation8 + $0xc0] sm:$0xff]  ;;  %v390_v33 = vld [vmem:[#allocation8 + $0xc8] sm:$0xff] }
 0x116   :  { %2119 = vmatprep.subr.bf16.mxu0 %v2118_v34 }
 0x117   :  { %2121 = vmatpush1.bf16.msra.mxu0 %v2120_v35 }
 0x11a   :  { %1853 = vmatmul.mubr.msk.f32.vlgmr.msra.gmra.mrb[0].mxu0 %vm413_vm0, %v365_v36  ;;  %v391_v36 = vld [vmem:[#allocation8 + $0xd0] sm:$0xff] }
 0x11b   :  { %532 = vmatprep.mubr.f32.mxu0 %v2417_v11 }
 0x11e   :  { %1854 = vmatmul.mubr.msk.f32.gmra.mrb[2].mxu0 %vm413_vm0, %v366_v37 }
 0x11f   :  { %538 = vmatprep.mubr.f32.mxu0 %v2417_v11 }
 0x122   :  { %1855 = vmatmul.mubr.msk.f32.gmra.mrb[4].mxu0 %vm413_vm0, %v367_v47  ;;  %v392_v47 = vld [vmem:[#allocation8 + $0xd8] sm:$0xff] }
 0x123   :  { %544 = vmatprep.mubr.f32.mxu0 %v2417_v11 }
 0x126   :  { %1856 = vmatmul.mubr.msk.f32.gmra.mrb[6].mxu0 %vm413_vm0, %v368_v48 }
 0x127   :  { %550 = vmatprep.mubr.f32.mxu0 %v2417_v11 }
 0x12a   :  { %1857 = vmatmul.mubr.msk.f32.gmra.mrb[8].mxu0 %vm413_vm0, %v369_v38 }
 0x12b   :  { %556 = vmatprep.mubr.f32.mxu0 %v2417_v11 }
 0x12e   :  { %1858 = vmatmul.mubr.msk.f32.gmra.mrb[10].mxu0 %vm413_vm0, %v370_v41 }
 0x12f   :  { %562 = vmatprep.mubr.f32.mxu0 %v2417_v11 }
 0x132   :  { %1859 = vmatmul.mubr.msk.f32.gmra.mrb[12].mxu0 %vm413_vm0, %v371_v42 }
 0x133   :  { %568 = vmatprep.mubr.f32.mxu0 %v2417_v11 }
 0x136   :  { %1860 = vmatmul.mubr.msk.f32.gmra.mrb[14].mxu0 %vm413_vm0, %v372_v43 }
 0x137   :  { %574 = vmatprep.mubr.f32.mxu0 %v2417_v11 }
 0x13a   :  { %1861 = vmatmul.mubr.msk.f32.gmra.mrb[16].mxu0 %vm413_vm0, %v373_v45 }
 0x13b   :  { %580 = vmatprep.mubr.f32.mxu0 %v2417_v11 }
 0x13e   :  { %1862 = vmatmul.mubr.msk.f32.gmra.mrb[18].mxu0 %vm413_vm0, %v374_v46 }
 0x13f   :  { %586 = vmatprep.mubr.f32.mxu0 %v2417_v11 }
 0x142   :  { %1863 = vmatmul.mubr.msk.f32.gmra.mrb[20].mxu0 %vm413_vm0, %v375_v49 }
 0x143   :  { %592 = vmatprep.mubr.f32.mxu0 %v2417_v11 }
 0x146   :  { %1864 = vmatmul.mubr.msk.f32.gmra.mrb[22].mxu0 %vm413_vm0, %v376_v50 }
 0x147   :  { %598 = vmatprep.mubr.f32.mxu0 %v2417_v11 }
 0x14a   :  { %1865 = vmatmul.mubr.msk.f32.gmra.mrb[24].mxu0 %vm413_vm0, %v377_v51  ;;  %v393_v51 = vld [vmem:[#allocation8 + $0xe0] sm:$0xff] }
 0x14b   :  { %604 = vmatprep.mubr.f32.mxu0 %v2417_v11 }
 0x14e   :  { %1866 = vmatmul.mubr.msk.f32.gmra.mrb[26].mxu0 %vm413_vm0, %v378_v52 }
 0x14f   :  { %610 = vmatprep.mubr.f32.mxu0 %v2417_v11 }
 0x152   :  { %1867 = vmatmul.mubr.msk.f32.gmra.mrb[28].mxu0 %vm413_vm0, %v379_v53 }
 0x153   :  { %616 = vmatprep.mubr.f32.mxu0 %v2417_v11 }
 0x156   :  { %1868 = vmatmul.mubr.msk.f32.gmra.mrb[30].mxu0 %vm413_vm0, %v380_v54  ;;  %v394_v54 = vld [vmem:[#allocation8 + $0xe8] sm:$0xff] }
 0x1ed   :  { %v528_v20 = vpop.f32.mrb[0].mxu0 }
 0x1ee   :  { %v530_v56 = vpop.f32.mrb[1].mxu0  ;;  %v529_v58 = vadd.f32 %v528_v20, %v381_v55 }
 0x1ef   :  { %v531_v60 = vadd.f32 %v530_v56, %v382_v44  ;;  %v395_v44 = vld [vmem:[#allocation8 + $0xf0] sm:$0xff] }
 0x1f0   :  { %v623_v3 = vmax.f32 %v529_v58, 0.0 }
 0x1f1   :  { %v534_v61 = vpop.f32.mrb[2].mxu0  ;;  %v624_v5 = vmax.f32 %v531_v60, 0.0 }
 0x1f2   :  { %v535_v62 = vadd.f32 %v534_v61, %v383_v57  ;;  %v536_v63 = vpop.f32.mrb[3].mxu0  ;;  %v396_v57 = vld [vmem:[#allocation8 + $0xf8] sm:$0xff] }
 0x1f3   :  { %v537_v2 = vadd.f32 %v536_v63, %v384_v59 }
 0x1f4   :  { %v625_v4 = vmax.f32 %v535_v62, 0.0 }
 0x1f5   :  { %v626_v7 = vmax.f32 %v537_v2, 0.0  ;;  %v540_v23 = vpop.f32.mrb[4].mxu0 }
 0x1f6   :  { %v542_v24 = vpop.f32.mrb[5].mxu0  ;;  %v2124_v8 = vpack.c.bf16 %v625_v4, %v623_v3  ;;  %v541_v16 = vadd.f32 %v540_v23, %v385_v9  ;;  %v398_v23 = vld [vmem:[#allocation8 + $0x108] sm:$0xff] }
 0x1f7   :  { %v2122_v15 = vpack.c.bf16 %v626_v7, %v624_v5  ;;  %v543_v18 = vadd.f32 %v542_v24, %v386_v10  ;;  %v397_v5 = vld [vmem:[#allocation8 + $0x100] sm:$0xff] }
 0x1f8   :  { %v627_v29 = vmax.f32 %v541_v16, 0.0 }
 0x1f9   :  { %v546_v21 = vpop.f32.mrb[6].mxu0  ;;  %2123 = vmatprep.subr.bf16.mxu1 %v2122_v15  ;;  %v628_v40 = vmax.f32 %v543_v18, 0.0  ;;  %v400_v15 = vld [vmem:[#allocation8 + $0x118] sm:$0xff] }
 0x1fa   :  { %v547_v22 = vadd.f32 %v546_v21, %v387_v12  ;;  %v548_v26 = vpop.f32.mrb[7].mxu0  ;;  %2125 = vmatpush1.bf16.msra.mxu1 %v2124_v8  ;;  %v399_v8 = vld [vmem:[#allocation8 + $0x110] sm:$0xff] }
 0x1fb   :  { %v549_v27 = vadd.f32 %v548_v26, %v388_v17 }
 0x1fc   :  { %v629_v39 = vmax.f32 %v547_v22, 0.0 }
 0x1fd   :  { %v630_v30 = vmax.f32 %v549_v27, 0.0  ;;  %v552_v31 = vpop.f32.mrb[8].mxu0 }
 0x1fe   :  { %v2128_v32 = vpack.c.bf16 %v629_v39, %v627_v29  ;;  %v554_v34 = vpop.f32.mrb[9].mxu0  ;;  %v553_v37 = vadd.f32 %v552_v31, %v389_v28  ;;  %v402_v31 = vld [vmem:[#allocation8 + $0x128] sm:$0xff] }
 0x1ff   :  { %v2126_v35 = vpack.c.bf16 %v630_v30, %v628_v40  ;;  %v555_v48 = vadd.f32 %v554_v34, %v390_v33  ;;  %v401_v40 = vld [vmem:[#allocation8 + $0x120] sm:$0xff]  ;;  %v403_v34 = vld [vmem:[#allocation8 + $0x130] sm:$0xff] }
 0x200   :  { %v631_v45 = vmax.f32 %v553_v37, 0.0 }
 0x201   :  { %v558_v38 = vpop.f32.mrb[10].mxu0  ;;  %2127 = vmatprep.subr.bf16.mxu1 %v2126_v35  ;;  %v632_v49 = vmax.f32 %v555_v48, 0.0 }
 0x202   :  { %v559_v41 = vadd.f32 %v558_v38, %v391_v36  ;;  %v560_v42 = vpop.f32.mrb[11].mxu0  ;;  %2129 = vmatpush1.bf16.msra.mxu1 %v2128_v32  ;;  %v404_v36 = vld [vmem:[#allocation8 + $0x138] sm:$0xff] }
 0x203   :  { %v561_v43 = vadd.f32 %v560_v42, %v392_v47 }
 0x204   :  { %v633_v46 = vmax.f32 %v559_v41, 0.0 }
 0x205   :  { %v634_v50 = vmax.f32 %v561_v43, 0.0  ;;  %v564_v52 = vpop.f32.mrb[12].mxu0 }
 0x206   :  { %v2132_v53 = vpack.c.bf16 %v633_v46, %v631_v45  ;;  %v566_v55 = vpop.f32.mrb[13].mxu0  ;;  %v565_v56 = vadd.f32 %v564_v52, %v393_v51  ;;  %v406_v52 = vld [vmem:[#allocation8 + $0x148] sm:$0xff] }
 0x207   :  { %v2130_v20 = vpack.c.bf16 %v634_v50, %v632_v49  ;;  %v567_v58 = vadd.f32 %v566_v55, %v394_v54  ;;  %v405_v49 = vld [vmem:[#allocation8 + $0x140] sm:$0xff]  ;;  %v407_v55 = vld [vmem:[#allocation8 + $0x150] sm:$0xff] }
 0x208   :  { %v635_v63 = vmax.f32 %v565_v56, 0.0 }
 0x209   :  { %v570_v59 = vpop.f32.mrb[14].mxu0  ;;  %2131 = vmatprep.subr.bf16.mxu1 %v2130_v20  ;;  %v636_v3 = vmax.f32 %v567_v58, 0.0 }
 0x20a   :  { %v571_v60 = vadd.f32 %v570_v59, %v395_v44  ;;  %v572_v61 = vpop.f32.mrb[15].mxu0  ;;  %2133 = vmatpush1.bf16.msra.mxu1 %v2132_v53  ;;  %v408_v44 = vld [vmem:[#allocation8 + $0x158] sm:$0xff] }
 0x20b   :  { %v573_v62 = vadd.f32 %v572_v61, %v396_v57 }
 0x20c   :  { %v637_v2 = vmax.f32 %v571_v60, 0.0 }
 0x20d   :  { %v638_v4 = vmax.f32 %v573_v62, 0.0  ;;  %v576_v7 = vpop.f32.mrb[16].mxu0 }
 0x20e   :  { %v2136_v9 = vpack.c.bf16 %v637_v2, %v635_v63  ;;  %v578_v10 = vpop.f32.mrb[17].mxu0  ;;  %v577_v12 = vadd.f32 %v576_v7, %v397_v5  ;;  %v410_v7 = vld [vmem:[#allocation8 + $0x168] sm:$0xff] }
 0x20f   :  { %v2134_v24 = vpack.c.bf16 %v638_v4, %v636_v3  ;;  %v579_v16 = vadd.f32 %v578_v10, %v398_v23  ;;  %v409_v3 = vld [vmem:[#allocation8 + $0x160] sm:$0xff]  ;;  %v411_v10 = vld [vmem:[#allocation8 + $0x170] sm:$0xff] }
 0x210   :  { %v639_v26 = vmax.f32 %v577_v12, 0.0 }
 0x211   :  { %v582_v17 = vpop.f32.mrb[18].mxu0  ;;  %2135 = vmatprep.subr.bf16.mxu1 %v2134_v24  ;;  %v640_v29 = vmax.f32 %v579_v16, 0.0 }
 0x212   :  { %v583_v18 = vadd.f32 %v582_v17, %v399_v8  ;;  %v584_v21 = vpop.f32.mrb[19].mxu0  ;;  %2137 = vmatpush1.bf16.msra.mxu1 %v2136_v9  ;;  %v412_v8 = vld [vmem:[#allocation8 + $0x178] sm:$0xff] }
 0x213   :  { %v585_v22 = vadd.f32 %v584_v21, %v400_v15 }
 0x214   :  { %v641_v27 = vmax.f32 %v583_v18, 0.0 }
 0x215   :  { %v642_v39 = vmax.f32 %v585_v22, 0.0  ;;  %v588_v30 = vpop.f32.mrb[20].mxu0 }
 0x216   :  { %v2140_v28 = vpack.c.bf16 %v641_v27, %v639_v26  ;;  %v590_v32 = vpop.f32.mrb[21].mxu0  ;;  %v589_v35 = vadd.f32 %v588_v30, %v401_v40  ;;  %v655_v40 = vld [vmem:[#allocation7 + $0xc0] sm:$0xff]  ;;  %v656_v30 = vld [vmem:[#allocation7 + $0xc8] sm:$0xff] }
 0x217   :  { %v2138_v33 = vpack.c.bf16 %v642_v39, %v640_v29  ;;  %v591_v37 = vadd.f32 %v590_v32, %v402_v31  ;;  %v658_v31 = vld [vmem:[#allocation7 + $0xd8] sm:$0xff]  ;;  %v659_v32 = vld [vmem:[#allocation8 + $0x180] sm:$0xff] }
 0x218   :  { %v643_v42 = vmax.f32 %v589_v35, 0.0 }
 0x219   :  { %v594_v47 = vpop.f32.mrb[22].mxu0  ;;  %2139 = vmatprep.subr.bf16.mxu1 %v2138_v33  ;;  %v644_v45 = vmax.f32 %v591_v37, 0.0  ;;  %v661_v37 = vld [vmem:[#allocation8 + $0x190] sm:$0xff] }
 0x21a   :  { %v595_v48 = vadd.f32 %v594_v47, %v403_v34  ;;  %v596_v38 = vpop.f32.mrb[23].mxu0  ;;  %2141 = vmatpush1.bf16.msra.mxu1 %v2140_v28  ;;  %v657_v28 = vld [vmem:[#allocation7 + $0xd0] sm:$0xff] }
 0x21b   :  { %v597_v41 = vadd.f32 %v596_v38, %v404_v36  ;;  %v660_v36 = vld [vmem:[#allocation8 + $0x188] sm:$0xff] }
 0x21c   :  { %v645_v43 = vmax.f32 %v595_v48, 0.0 }
 0x21d   :  { %v646_v46 = vmax.f32 %v597_v41, 0.0  ;;  %v600_v50 = vpop.f32.mrb[24].mxu0 }
 0x21e   :  { %v2144_v51 = vpack.c.bf16 %v645_v43, %v643_v42  ;;  %v602_v53 = vpop.f32.mrb[25].mxu0  ;;  %v601_v20 = vadd.f32 %v600_v50, %v405_v49  ;;  %v662_v42 = vld [vmem:[#allocation8 + $0x198] sm:$0xff]  ;;  %v663_v43 = vld [vmem:[#allocation8 + $0x1a0] sm:$0xff] }
 0x21f   :  { %v2142_v54 = vpack.c.bf16 %v646_v46, %v644_v45  ;;  %v603_v56 = vadd.f32 %v602_v53, %v406_v52  ;;  %v665_v52 = vld [vmem:[#allocation8 + $0x1b0] sm:$0xff] }
 0x220   :  { %v647_v61 = vmax.f32 %v601_v20, 0.0 }
 0x221   :  { %v606_v57 = vpop.f32.mrb[26].mxu0  ;;  %2143 = vmatprep.subr.bf16.mxu1 %v2142_v54  ;;  %v648_v63 = vmax.f32 %v603_v56, 0.0 }
 0x222   :  { %v607_v58 = vadd.f32 %v606_v57, %v407_v55  ;;  %v608_v59 = vpop.f32.mrb[27].mxu0  ;;  %2145 = vmatpush1.bf16.msra.mxu1 %v2144_v51  ;;  %v664_v51 = vld [vmem:[#allocation8 + $0x1a8] sm:$0xff]  ;;  %v777_v57 = vld [vmem:[#allocation7 + $0xe0] sm:$0xff] }
 0x223   :  { %v609_v60 = vadd.f32 %v608_v59, %v408_v44  ;;  %v666_v44 = vld [vmem:[#allocation8 + $0x1b8] sm:$0xff] }
 0x224   :  { %v649_v62 = vmax.f32 %v607_v58, 0.0 }
 0x225   :  { %v650_v2 = vmax.f32 %v609_v60, 0.0  ;;  %v612_v4 = vpop.f32.mrb[28].mxu0 }
 0x226   :  { %v2148_v5 = vpack.c.bf16 %v649_v62, %v647_v61  ;;  %v614_v9 = vpop.f32.mrb[29].mxu0  ;;  %v613_v24 = vadd.f32 %v612_v4, %v409_v3 }
 0x227   :  { %v2146_v23 = vpack.c.bf16 %v650_v2, %v648_v63  ;;  %v615_v12 = vadd.f32 %v614_v9, %v410_v7 }
 0x228   :  { %v651_v21 = vmax.f32 %v613_v24, 0.0  ;;  %v778_v24 = vld [vmem:[#allocation7 + $0xe8] sm:$0xff] }
 0x229   :  { %v618_v15 = vpop.f32.mrb[30].mxu0  ;;  %2147 = vmatprep.subr.bf16.mxu1 %v2146_v23  ;;  %v652_v26 = vmax.f32 %v615_v12, 0.0  ;;  %v780_v12 = vld [vmem:[#allocation7 + $0xf8] sm:$0xff] }
 0x22a   :  { %v619_v16 = vadd.f32 %v618_v15, %v411_v10  ;;  %v620_v17 = vpop.f32.mrb[31].mxu0  ;;  %2149 = vmatpush1.bf16.msra.mxu1 %v2148_v5  ;;  %v887_v15 = vld [vmem:[#allocation7 + $0x100] sm:$0xff] }
 0x22b   :  { %v621_v18 = vadd.f32 %v620_v17, %v412_v8  ;;  %v779_v8 = vld [vmem:[#allocation7 + $0xf0] sm:$0xff]  ;;  %v1054_v17 = vld [vmem:[#allocation7 + $0x128] sm:$0xff] }
 0x22c   :  { %v653_v22 = vmax.f32 %v619_v16, 0.0  ;;  %v1053_v16 = vld [vmem:[#allocation7 + $0x120] sm:$0xff] }
 0x22d   :  { %v654_v27 = vmax.f32 %v621_v18, 0.0  ;;  %v2418_v18 = vmov 3  }
 0x22e   :  { %v2152_v29 = vpack.c.bf16 %v653_v22, %v651_v21  ;;  %2266 = vset.pattern.permute.xlu0 %v2418_v18  ;;  %v2641_v21 = vld [vmem:[#allocation7 + $0x130] sm:$0xff]  ;;  %v2645_v22 = vld [vmem:[#allocation7 + $0x148] sm:$0xff] }
 0x22f   :  { %v2150_v39 = vpack.c.bf16 %v654_v27, %v652_v26  ;;  %v1056_v26 = vld [vmem:[#allocation7 + $0x138] sm:$0xff]  ;;  %v1057_v27 = vld [vmem:[#allocation7 + $0x140] sm:$0xff] }
 0x231   :  { %2151 = vmatprep.subr.bf16.mxu1 %v2150_v39  ;;  %v782_v39 = vld [vmem:[#allocation8 + $0x1d0] sm:$0xff] }
 0x232   :  { %2153 = vmatpush1.bf16.msra.mxu1 %v2152_v29  ;;  %v2659_v29 = vld [vmem:[#allocation7 + $0x158] sm:$0xff] }
 0x235   :  { %732 = vmatmul.mubr.f32.vlgmr.msra.gmra.mrb[0].mxu1 %v655_v40  ;;  %v781_v40 = vld [vmem:[#allocation8 + $0x1c0] sm:$0xff] }
 0x236   :  { %737 = vmatprep.mubr.f32.mxu1 %v2417_v11 }
 0x239   :  { %738 = vmatmul.mubr.f32.gmra.mrb[2].mxu1 %v656_v30 }
 0x23a   :  { %743 = vmatprep.mubr.f32.mxu1 %v2417_v11 }
 0x23d   :  { %744 = vmatmul.mubr.f32.gmra.mrb[4].mxu1 %v657_v28 }
 0x23e   :  { %749 = vmatprep.mubr.f32.mxu1 %v2417_v11 }
 0x241   :  { %750 = vmatmul.mubr.f32.gmra.mrb[6].mxu1 %v658_v31 }
 0x242   :  { %1983 = vmatprep.mubr.msk.f32.mxu1 %vm785_vm1, %v777_v57 }
 0x308   :  { %v733_v33 = vpop.f32.mrb[0].mxu1 }
 0x309   :  { %v734_v34 = vadd.f32 %v733_v33, %v659_v32  ;;  %v735_v35 = vpop.f32.mrb[1].mxu1  ;;  %v784_v33 = vld [vmem:[#allocation8 + $0x1f0] sm:$0xff] }
 0x30a   :  { %v736_v48 = vadd.f32 %v735_v35, %v660_v36  ;;  %v783_v35 = vld [vmem:[#allocation8 + $0x1e0] sm:$0xff] }
 0x30b   :  { %756 = vmax.xlane.f32.xlu0 %v734_v34 }
 0x30c   :  { %v739_v47 = vpop.f32.mrb[2].mxu1 }
 0x30d   :  { %v740_v38 = vadd.f32 %v739_v47, %v661_v37  ;;  %v741_v41 = vpop.f32.mrb[3].mxu1 }
 0x30e   :  { %v742_v46 = vadd.f32 %v741_v41, %v662_v42 }
 0x30f   :  { %758 = vmax.xlane.f32.xlu1 %v740_v38  ;;  %764 = vmax.xlane.f32.xlu0 %v736_v48 }
 0x310   :  { %v745_v45 = vpop.f32.mrb[4].mxu1 }
 0x311   :  { %v746_v49 = vadd.f32 %v745_v45, %v663_v43  ;;  %v747_v50 = vpop.f32.mrb[5].mxu1 }
 0x312   :  { %v748_v54 = vadd.f32 %v747_v50, %v664_v51  ;;  %v890_v50 = vld [vmem:[#allocation7 + $0x118] sm:$0xff]  ;;  %v1059_v51 = vld [vmem:[#allocation7 + $0x150] sm:$0xff] }
 0x313   :  { %760 = vmax.xlane.f32.xlu1 %v746_v49  ;;  %766 = vmax.xlane.f32.xlu0 %v742_v46  ;;  %v888_v46 = vld [vmem:[#allocation7 + $0x108] sm:$0xff]  ;;  %v889_v49 = vld [vmem:[#allocation7 + $0x110] sm:$0xff] }
 0x314   :  { %v751_v53 = vpop.f32.mrb[6].mxu1 }
 0x315   :  { %v752_v55 = vadd.f32 %v751_v53, %v665_v52  ;;  %v753_v20 = vpop.f32.mrb[7].mxu1  ;;  %v892_v52 = vld [vmem:[#allocation8 + $0x210] sm:$0xff] }
 0x316   :  { %v754_v56 = vadd.f32 %v753_v20, %v666_v44  ;;  %v891_v20 = vld [vmem:[#allocation8 + $0x200] sm:$0xff] }
 0x317   :  { %768 = vmax.xlane.f32.xlu1 %v748_v54  ;;  %762 = vmax.xlane.f32.xlu0 %v752_v55 }
 0x31b   :  { %770 = vmax.xlane.f32.xlu0 %v754_v56 }
 0x328   :  { %1079 = vperm.xlu1 %2260, %v1053_v16  }
 0x32c   :  { %1084 = vperm.xlu1 %2260, %v1054_v17  }
 0x330   :  { %2261 = vset.pattern.permute.xlu1 %v2414_v0 }
 0x331   :  { %1246 = vperm.xlu0 %2266, %v1054_v17   ;;  %1142 = vperm.xlu1 %2261, %v1054_v17  }
 0x335   :  { %2267 = vset.pattern.permute.xlu0 %v2414_v0  ;;  %2262 = vset.pattern.permute.xlu1 %v2415_v1 }
 0x336   :  { %1138 = vperm.xlu0 %2267, %v1053_v16   ;;  %1089 = vperm.xlu1 %2262, %v2641_v21  }
 0x33a   :  { %1146 = vperm.xlu0 %2267, %v2641_v21   ;;  %2263 = vset.pattern.permute.xlu1 %v2416_v6 }
 0x33b   :  { %1190 = vperm.xlu1 %2263, %v1053_v16  }
 0x33e   :  { %1158 = vperm.xlu0 %2267, %v2645_v22  }
 0x33f   :  { %1194 = vperm.xlu1 %2263, %v1054_v17  }
 0x342   :  { %2271 = vset.pattern.permute.xlu0 %v2415_v1 }
 0x343   :  { %1094 = vperm.xlu0 %2271, %v1056_v26   ;;  %2264 = vset.pattern.permute.xlu1 %v2414_v0 }
 0x344   :  { %1150 = vperm.xlu1 %2264, %v1056_v26  }
 0x347   :  { %1109 = vperm.xlu0 %2271, %v1059_v51  }
 0x348   :  { %2265 = vset.pattern.permute.xlu1 %v2418_v18 }
 0x349   :  { %1242 = vperm.xlu1 %2265, %v1053_v16  }
 0x34d   :  { %2268 = vset.pattern.permute.xlu1 %v2415_v1 }
 0x34e   :  { %1099 = vperm.xlu1 %2268, %v1057_v27  }
 0x352   :  { %1104 = vperm.xlu1 %2268, %v2645_v22  }
 0x356   :  { %2269 = vset.pattern.permute.xlu1 %v2416_v6 }
 0x357   :  { %1202 = vperm.xlu1 %2269, %v1056_v26  }
 0x35b   :  { %2270 = vset.pattern.permute.xlu1 %v2414_v0 }
 0x35c   :  { %1154 = vperm.xlu1 %2270, %v1057_v27  }
 0x360   :  { %2272 = vset.pattern.permute.xlu1 %v2418_v18 }
 0x361   :  { %1250 = vperm.xlu1 %2272, %v2641_v21  }
 0x365   :  { %1254 = vperm.xlu1 %2272, %v1056_v26  }
 0x369   :  { %2273 = vset.pattern.permute.xlu1 %v2415_v1 }
 0x36a   :  { %1114 = vperm.xlu1 %2273, %v2659_v29  }
 0x36e   :  { %2274 = vset.pattern.permute.xlu1 %v2416_v6 }
 0x36f   :  { %1206 = vperm.xlu1 %2274, %v1057_v27  }
 0x373   :  { %2275 = vset.pattern.permute.xlu1 %v2414_v0 }
 0x374   :  { %1162 = vperm.xlu1 %2275, %v1059_v51  }
 0x398   :  { %v757_v58 = vpop.xlane.xlu0 %756 }
 0x39c   :  { %v759_v59 = vpop.xlane.xlu1 %758  ;;  %v765_v60 = vpop.xlane.xlu0 %764 }
 0x39d   :  { %v773_v63 = vsel %vm772_vm2, %v757_v58, %v765_v60  ;;  %v894_v60 = vld [vmem:[#allocation8 + $0x230] sm:$0xff] }
 0x3a0   :  { %v761_v61 = vpop.xlane.xlu1 %760  ;;  %v767_v62 = vpop.xlane.xlu0 %766 }
 0x3a1   :  { %v774_v2 = vsel %vm772_vm2, %v759_v59, %v767_v62 }
 0x3a2   :  { %v2154_v3 = vpack.c.bf16 %v774_v2, %v773_v63  ;;  %v893_v63 = vld [vmem:[#allocation8 + $0x220] sm:$0xff] }
 0x3a4   :  { %2155 = vmatprep.subr.bf16.mxu1 %v2154_v3  ;;  %v763_v4 = vpop.xlane.xlu0 %762  ;;  %v769_v5 = vpop.xlane.xlu1 %768 }
 0x3a5   :  { %2157 = vmatpush3.bf16.msra.mxu1 %v2154_v3  ;;  %v775_v9 = vsel %vm772_vm2, %v761_v61, %v769_v5 }
 0x3a8   :  { %v771_v7 = vpop.xlane.xlu0 %770 }
 0x3a9   :  { %v776_v23 = vsel %vm772_vm2, %v763_v4, %v771_v7  ;;  %v1080_v4 = vpop.permute.xlu1 %1079 }
 0x3aa   :  { %v2158_v10 = vpack.c.bf16 %v776_v23, %v775_v9  ;;  %v1301_v23 = vld [vmem:[#allocation7 + $0x160] sm:$0xff] }
 0x3ac   :  { %2159 = vmatprep.subr.bf16.mxu1 %v2158_v10 }
 0x3ad   :  { %2161 = vmatpush3.bf16.msra.mxu1 %v2158_v10  ;;  %v1085_v5 = vpop.permute.xlu1 %1084 }
 0x3b0   :  { %1984 = vmatmul.mubr.msk.f32.vlgmr.msra.gmra.mrb[8].mxu1 %vm785_vm1, %v778_v24 }
 0x3b1   :  { %1986 = vmatprep.mubr.msk.f32.mxu1 %vm785_vm1, %v779_v8  ;;  %v1143_v7 = vpop.permute.xlu1 %1142 }
 0x3b4   :  { %1987 = vmatmul.mubr.msk.f32.gmra.mrb[10].mxu1 %vm785_vm1, %v780_v12 }
 0x3b5   :  { %1997 = vmatprep.mubr.msk.f32.mxu1 %vm785_vm1, %v887_v15  ;;  %v1247_v15 = vpop.permute.xlu0 %1246 }
 0x3b9   :  { %v1139_v17 = vpop.permute.xlu0 %1138 }
 0x483   :  { %v1985_v30 = vpop.f32.mrb[8].mxu1 }
 0x484   :  { %v870_v28 = vadd.f32 %v1985_v30, %v782_v39  ;;  %v864_v31 = vpop.f32.mrb[9].mxu1 }
 0x485   :  { %v865_v32 = vadd.f32 %v864_v31, %v781_v40  ;;  %v1037_v31 = vld [vmem:[#allocation8 + $0x2d0] sm:$0xff] }
 0x486   :  { %v884_v34 = vmax.f32 %v870_v28, 0.0  ;;  %v1052_v28 = vld [vmem:[#allocation5] sm:$0xf] }
 0x487   :  { %v883_v36 = vmax.f32 %v865_v32, 0.0  ;;  %v1988_v37 = vpop.f32.mrb[10].mxu1  ;;  %v2716_v32 = vrot.slane %v1052_v28, %v2515_v14  ;;  %v2725_v14 = vrot.slane %v1052_v28, %v2530_v25 }
 0x488   :  { %v880_v47 = vadd.f32 %v1988_v37, %v784_v33  ;;  %v874_v48 = vpop.f32.mrb[11].mxu1  ;;  %v2720_v37 = vrot.slane %v1052_v28, %v2520_v19  ;;  %v1275_v19 = vsub.s32 3, %v2512_v13  ;;  %v1039_v13 = vld [vmem:[#allocation8 + $0x2f0] sm:$0xff] }
 0x489   :  { %v2162_v38 = vpack.c.bf16 %v884_v34, %v883_v36  ;;  %v875_v41 = vadd.f32 %v874_v48, %v783_v35  ;;  %v1062_v35 = vld [vmem:[#allocation8 + $0x250] sm:$0xff]  ;;  %v1122_v48 = vmul.f32 %v2716_v32, %v1085_v5 }
 0x48a   :  { %v886_v42 = vmax.f32 %v880_v47, 0.0 }
 0x48b   :  { %v885_v43 = vmax.f32 %v875_v41, 0.0  ;;  %2163 = vmatprep.subr.bf16.mxu1 %v2162_v38 }
 0x48c   :  { %2165 = vmatpush3.bf16.msra.mxu1 %v2162_v38 }
 0x48d   :  { %v2166_v45 = vpack.c.bf16 %v886_v42, %v885_v43  ;;  %v1174_v42 = vmul.f32 %v2720_v37, %v1143_v7  ;;  %v1065_v7 = vld [vmem:[#allocation8 + $0x280] sm:$0xff] }
 0x48f   :  { %2167 = vmatprep.subr.bf16.mxu1 %v2166_v45 }
 0x490   :  { %2169 = vmatpush3.bf16.msra.mxu1 %v2166_v45 }
 0x493   :  { %1998 = vmatmul.mubr.msk.f32.vlgmr.msra.gmra.mrb[12].mxu1 %vm785_vm1, %v888_v46  ;;  %v1036_v46 = vld [vmem:[#allocation8 + $0x2c0] sm:$0xff] }
 0x494   :  { %2000 = vmatprep.mubr.msk.f32.mxu1 %vm785_vm1, %v889_v49 }
 0x497   :  { %2001 = vmatmul.mubr.msk.f32.gmra.mrb[14].mxu1 %vm785_vm1, %v890_v50  ;;  %v1061_v50 = vld [vmem:[#allocation8 + $0x240] sm:$0xff] }
 0x498   :  { %2019 = vmatprep.mubr.msk.f32.mxu1 %vm413_vm0, %v1301_v23 }
 0x566   :  { %v1999_v53 = vpop.f32.mrb[12].mxu1 }
 0x567   :  { %v979_v54 = vadd.f32 %v1999_v53, %v892_v52  ;;  %v973_v55 = vpop.f32.mrb[13].mxu1  ;;  %v1121_v53 = vmul.f32 %v2716_v32, %v1080_v4 }
 0x568   :  { %v974_v56 = vadd.f32 %v973_v55, %v891_v20 }
 0x569   :  { %v993_v44 = vmax.f32 %v979_v54, 0.0 }
 0x56a   :  { %v2002_v57 = vpop.f32.mrb[14].mxu1  ;;  %v992_v59 = vmax.f32 %v974_v56, 0.0  ;;  %v1173_v56 = vmul.f32 %v2720_v37, %v1139_v17  ;;  %v1041_v17 = vld [vmem:[#allocation8 + $0x310] sm:$0xff] }
 0x56b   :  { %1021 = vperm.xlu1 %2275, %v993_v44   ;;  %1003 = vperm.xlu0 %2271, %v993_v44   ;;  %v983_v58 = vpop.f32.mrb[15].mxu1  ;;  %v989_v61 = vadd.f32 %v2002_v57, %v894_v60  ;;  %v2731_v44 = vrot.slane %v1052_v28, %v1275_v19 }
 0x56c   :  { %v984_v2 = vadd.f32 %v983_v58, %v893_v63  ;;  %v1040_v58 = vld [vmem:[#allocation8 + $0x300] sm:$0xff] }
 0x56d   :  { %v995_v62 = vmax.f32 %v989_v61, 0.0  ;;  %v1278_v60 = vmul.f32 %v2731_v44, %v1247_v15 }
 0x56e   :  { %v994_v3 = vmax.f32 %v984_v2, 0.0 }
 0x56f   :  { %2276 = vset.pattern.permute.xlu1 %v2415_v1  ;;  %2282 = vset.pattern.permute.xlu0 %v2418_v18 }
 0x570   :  { %1258 = vperm.xlu0 %2282, %v1057_v27   ;;  %998 = vperm.xlu1 %2276, %v992_v59  }
 0x574   :  { %2283 = vset.pattern.permute.xlu0 %v2416_v6  ;;  %2277 = vset.pattern.permute.xlu1 %v2414_v0 }
 0x575   :  { %1198 = vperm.xlu0 %2283, %v2641_v21   ;;  %1017 = vperm.xlu1 %2277, %v992_v59   ;;  %v2701_v21 = vpop.permute.xlu0 %1146 }
 0x579   :  { %1210 = vperm.xlu0 %2283, %v2645_v22   ;;  %2278 = vset.pattern.permute.xlu1 %v2415_v1  ;;  %v2707_v27 = vpop.permute.xlu0 %1158 }
 0x57a   :  { %1013 = vperm.xlu1 %2278, %v995_v62  }
 0x57d   :  { %1218 = vperm.xlu0 %2283, %v2659_v29   ;;  %v1095_v39 = vpop.permute.xlu0 %1094 }
 0x57e   :  { %2279 = vset.pattern.permute.xlu1 %v2414_v0 }
 0x57f   :  { %1029 = vperm.xlu1 %2279, %v995_v62  }
 0x581   :  { %2287 = vset.pattern.permute.xlu0 %v2418_v18  ;;  %v2713_v30 = vpop.permute.xlu0 %1109 }
 0x583   :  { %2280 = vset.pattern.permute.xlu1 %v2415_v1  ;;  %v2685_v1 = vpop.permute.xlu1 %1089 }
 0x584   :  { %1008 = vperm.xlu1 %2280, %v994_v3  }
 0x588   :  { %2281 = vset.pattern.permute.xlu1 %v2414_v0  ;;  %v1191_v0 = vpop.permute.xlu1 %1190 }
 0x589   :  { %1025 = vperm.xlu1 %2281, %v994_v3   ;;  %v1225_v59 = vmul.f32 %v2725_v14, %v1191_v0  ;;  %v1124_v0 = vmul.f32 %v2716_v32, %v1095_v39 }
 0x58c   :  { %v1195_v9 = vpop.permute.xlu1 %1194 }
 0x58d   :  { %1166 = vperm.xlu1 %2281, %v2659_v29   ;;  %v1226_v54 = vmul.f32 %v2725_v14, %v1195_v9  ;;  %v1064_v9 = vld [vmem:[#allocation8 + $0x270] sm:$0xff] }
 0x590   :  { %v2689_v10 = vpop.permute.xlu1 %1150 }
 0x591   :  { %2284 = vset.pattern.permute.xlu1 %v2418_v18  ;;  %v1176_v39 = vmul.f32 %v2720_v37, %v2689_v10  ;;  %v1123_v10 = vmul.f32 %v2716_v32, %v2685_v1 }
 0x592   :  { %1262 = vperm.xlu1 %2284, %v2645_v22  }
 0x594   :  { %v1243_v24 = vpop.permute.xlu1 %1242 }
 0x595   :  { %v1277_v62 = vmul.f32 %v2731_v44, %v1243_v24 }
 0x596   :  { %2285 = vset.pattern.permute.xlu1 %v2416_v6 }
 0x597   :  { %1214 = vperm.xlu1 %2285, %v1059_v51  }
 0x598   :  { %v2691_v8 = vpop.permute.xlu1 %1099 }
 0x59b   :  { %2286 = vset.pattern.permute.xlu1 %v2418_v18 }
 0x59c   :  { %1266 = vperm.xlu1 %2286, %v1059_v51   ;;  %v2693_v6 = vpop.permute.xlu1 %1104 }
 0x5a0   :  { %1270 = vperm.xlu1 %2286, %v2659_v29   ;;  %v2695_v12 = vpop.permute.xlu1 %1202 }
 0x5a4   :  { %v2697_v16 = vpop.permute.xlu1 %1154 }
 0x5a8   :  { %v2699_v18 = vpop.permute.xlu1 %1250 }
 0x5ac   :  { %v2703_v22 = vpop.permute.xlu1 %1254 }
 0x5b0   :  { %v2705_v26 = vpop.permute.xlu1 %1114 }
 0x5b4   :  { %v2709_v29 = vpop.permute.xlu1 %1206 }
 0x5b8   :  { %v2711_v40 = vpop.permute.xlu1 %1162 }
 0x5ea   :  { %v1022_v33 = vpop.permute.xlu1 %1021  ;;  %v1004_v34 = vpop.permute.xlu0 %1003 }
 0x5eb   :  { %v1033_v36 = vsel %vm413_vm0, %v1004_v34, %v1022_v33 }
 0x5ec   :  { %v1045_v47 = vmul.f32 %v1037_v31, %v1033_v36 }
 0x5ee   :  { %v1070_v38 = vadd.f32 %v1062_v35, %v1045_v47  ;;  %v1049_v47 = vmul.f32 %v1041_v17, %v1033_v36  ;;  %v1068_v17 = vld [vmem:[#allocation8 + $0x2b0] sm:$0xff] }
 0x5ef   :  { %v999_v41 = vpop.permute.xlu1 %998  ;;  %v1259_v63 = vpop.permute.xlu0 %1258 }
 0x5f0   :  { %v1130_v43 = vadd.f32 %v1122_v48, %v1070_v38  ;;  %v1125_v48 = vmul.f32 %v2716_v32, %v2691_v8  ;;  %v1066_v38 = vld [vmem:[#allocation8 + $0x290] sm:$0xff]  ;;  %v1063_v8 = vld [vmem:[#allocation8 + $0x260] sm:$0xff] }
 0x5f2   :  { %v1182_v45 = vadd.f32 %v1174_v42, %v1130_v43 }
 0x5f4   :  { %v1018_v49 = vpop.permute.xlu1 %1017  ;;  %v1234_v25 = vadd.f32 %v1226_v54, %v1182_v45 }
 0x5f5   :  { %v1032_v51 = vsel %vm413_vm0, %v999_v41, %v1018_v49  ;;  %v1199_v41 = vpop.permute.xlu0 %1198  ;;  %v1038_v49 = vld [vmem:[#allocation8 + $0x2e0] sm:$0xff] }
 0x5f6   :  { %v1044_v52 = vmul.f32 %v1036_v46, %v1032_v51  ;;  %v1048_v2 = vmul.f32 %v1040_v58, %v1032_v51  ;;  %v1286_v5 = vadd.f32 %v1278_v60, %v1234_v25  ;;  %v1074_v46 = vadd.f32 %v1066_v38, %v1049_v47 }
 0x5f7   :  { %v1126_v51 = vmul.f32 %v2716_v32, %v2693_v6  ;;  %v1229_v6 = vmul.f32 %v2725_v14, %v2709_v29  ;;  %v1175_v58 = vmul.f32 %v2720_v37, %v2701_v21  ;;  %v1280_v29 = vmul.f32 %v2731_v44, %v2703_v22 }
 0x5f8   :  { %v1069_v55 = vadd.f32 %v1061_v50, %v1044_v52  ;;  %v1073_v33 = vadd.f32 %v1065_v7, %v1048_v2  ;;  %v1294_v35 = vmax.f32 %v1286_v5, 0.0  ;;  %v1177_v50 = vmul.f32 %v2720_v37, %v2697_v16  ;;  %v1067_v7 = vld [vmem:[#allocation8 + $0x2a0] sm:$0xff] }
 0x5f9   :  { %v1014_v20 = vpop.permute.xlu1 %1013  ;;  %v1228_v16 = vmul.f32 %v2725_v14, %v2695_v12  ;;  %v1279_v21 = vmul.f32 %v2731_v44, %v2699_v18  ;;  %v1127_v22 = vmul.f32 %v2716_v32, %v2713_v30 }
 0x5fa   :  { %v1129_v57 = vadd.f32 %v1121_v53, %v1069_v55  ;;  %v1133_v43 = vadd.f32 %v1125_v48, %v1073_v33  ;;  %v1211_v53 = vpop.permute.xlu0 %1210 }
 0x5fb   :  { %v1230_v60 = vmul.f32 %v2725_v14, %v1211_v53 }
 0x5fc   :  { %v1181_v61 = vadd.f32 %v1173_v56, %v1129_v57  ;;  %v1185_v52 = vadd.f32 %v1177_v50, %v1133_v43  ;;  %v1134_v56 = vadd.f32 %v1126_v51, %v1074_v46 }
 0x5fe   :  { %v1030_v3 = vpop.permute.xlu1 %1029  ;;  %v1233_v4 = vadd.f32 %v1225_v59, %v1181_v61  ;;  %v1281_v59 = vmul.f32 %v2731_v44, %v1259_v63  ;;  %v1227_v61 = vmul.f32 %v2725_v14, %v1199_v41  ;;  %v1237_v2 = vadd.f32 %v1229_v6, %v1185_v52  ;;  %v1305_v6 = vld [vmem:[#allocation7 + $0x180] sm:$0xff] }
 0x5ff   :  { %v1035_v23 = vsel %vm413_vm0, %v1014_v20, %v1030_v3  ;;  %v1178_v20 = vmul.f32 %v2720_v37, %v2707_v27  ;;  %v1042_v27 = vld [vmem:[#allocation8 + $0x320] sm:$0xff]  ;;  %v1128_v41 = vmul.f32 %v2716_v32, %v2705_v26 }
 0x600   :  { %v1047_v28 = vmul.f32 %v1039_v13, %v1035_v23  ;;  %v1285_v31 = vadd.f32 %v1277_v62, %v1233_v4  ;;  %v1043_v13 = vld [vmem:[#allocation8 + $0x330] sm:$0xff]  ;;  %v1289_v33 = vadd.f32 %v1281_v59, %v1237_v2 }
 0x601   :  { %v1186_v12 = vadd.f32 %v1178_v20, %v1134_v56  ;;  %v1051_v63 = vmul.f32 %v1043_v13, %v1035_v23  ;;  %v1310_v59 = vld [vmem:[#allocation8 + $0x350] sm:$0xff] }
 0x602   :  { %v1072_v15 = vadd.f32 %v1064_v9, %v1047_v28  ;;  %v1293_v34 = vmax.f32 %v1285_v31, 0.0  ;;  %v1297_v23 = vmax.f32 %v1289_v33, 0.0 }
 0x603   :  { %v1009_v24 = vpop.permute.xlu1 %1008  ;;  %v1238_v5 = vadd.f32 %v1230_v60, %v1186_v12  ;;  %v1076_v47 = vadd.f32 %v1068_v17, %v1051_v63  ;;  %v1309_v60 = vld [vmem:[#allocation8 + $0x340] sm:$0xff] }
 0x604   :  { %v2170_v42 = vpack.c.bf16 %v1294_v35, %v1293_v34  ;;  %v1132_v45 = vadd.f32 %v1124_v0, %v1072_v15  ;;  %v1311_v12 = vld [vmem:[#allocation8 + $0x360] sm:$0xff] }
 0x605   :  { %v1136_v50 = vadd.f32 %v1128_v41, %v1076_v47  ;;  %v1313_v17 = vld [vmem:[#allocation8 + $0x380] sm:$0xff] }
 0x606   :  { %2171 = vmatprep.subr.bf16.mxu1 %v2170_v42  ;;  %v1184_v54 = vadd.f32 %v1176_v39, %v1132_v45  ;;  %v1179_v39 = vmul.f32 %v2720_v37, %v2711_v40  ;;  %v1315_v47 = vld [vmem:[#allocation8 + $0x3a0] sm:$0xff] }
 0x607   :  { %2173 = vmatpush3.bf16.msra.mxu1 %v2170_v42 }
 0x608   :  { %v1026_v36 = vpop.permute.xlu1 %1025  ;;  %v1236_v62 = vadd.f32 %v1228_v16, %v1184_v54  ;;  %v1303_v16 = vld [vmem:[#allocation7 + $0x170] sm:$0xff] }
 0x609   :  { %v1034_v19 = vsel %vm413_vm0, %v1009_v24, %v1026_v36 }
 0x60a   :  { %v1046_v55 = vmul.f32 %v1038_v49, %v1034_v19  ;;  %v1050_v3 = vmul.f32 %v1042_v27, %v1034_v19  ;;  %v1288_v0 = vadd.f32 %v1280_v29, %v1236_v62  ;;  %v1219_v49 = vpop.permute.xlu0 %1218  ;;  %v1312_v62 = vld [vmem:[#allocation8 + $0x370] sm:$0xff] }
 0x60c   :  { %v1071_v57 = vadd.f32 %v1063_v8, %v1046_v55  ;;  %v1167_v25 = vpop.permute.xlu1 %1166  ;;  %v1075_v15 = vadd.f32 %v1067_v7, %v1050_v3  ;;  %v1296_v38 = vmax.f32 %v1288_v0, 0.0  ;;  %v1232_v8 = vmul.f32 %v2725_v14, %v1219_v49  ;;  %v1314_v7 = vld [vmem:[#allocation8 + $0x390] sm:$0xff]  ;;  %v1456_v49 = vld [vmem:[#allocation7 + $0x1b0] sm:$0xff] }
 0x60d   :  { %v1180_v42 = vmul.f32 %v2720_v37, %v1167_v25  ;;  %v1308_v25 = vld [vmem:[#allocation7 + $0x198] sm:$0xff] }
 0x60e   :  { %v1131_v1 = vadd.f32 %v1123_v10, %v1071_v57  ;;  %v1135_v43 = vadd.f32 %v1127_v22, %v1075_v15  ;;  %v1302_v10 = vld [vmem:[#allocation7 + $0x168] sm:$0xff] }
 0x60f   :  { %v1188_v51 = vadd.f32 %v1180_v42, %v1136_v50  ;;  %v1306_v57 = vld [vmem:[#allocation7 + $0x188] sm:$0xff]  ;;  %v1458_v50 = vld [vmem:[#allocation7 + $0x1c0] sm:$0xff] }
 0x610   :  { %v1183_v4 = vadd.f32 %v1175_v58, %v1131_v1  ;;  %v1187_v19 = vadd.f32 %v1179_v39, %v1135_v43  ;;  %v1454_v58 = vld [vmem:[#allocation7 + $0x1a0] sm:$0xff]  ;;  %v1457_v39 = vld [vmem:[#allocation7 + $0x1b8] sm:$0xff] }
 0x611   :  { %v1263_v9 = vpop.permute.xlu1 %1262  ;;  %v1240_v53 = vadd.f32 %v1232_v8, %v1188_v51  ;;  %2047 = vmatprep.mubr.msk.f32.mxu0 %vm413_vm0, %v1454_v58  ;;  %v1461_v51 = vld [vmem:[#allocation7 + $0x1d8] sm:$0xff]  ;;  %v1607_v8 = vld [vmem:[#allocation7 + $0x1e0] sm:$0xff] }
 0x612   :  { %v1282_v28 = vmul.f32 %v2731_v44, %v1263_v9  ;;  %v1235_v31 = vadd.f32 %v1227_v61, %v1183_v4 }
 0x614   :  { %v1290_v34 = vadd.f32 %v1282_v28, %v1238_v5  ;;  %v1287_v35 = vadd.f32 %v1279_v21, %v1235_v31 }
 0x616   :  { %v1298_v24 = vmax.f32 %v1290_v34, 0.0  ;;  %v1215_v48 = vpop.permute.xlu1 %1214  ;;  %v1295_v18 = vmax.f32 %v1287_v35, 0.0  ;;  %v1316_v35 = vld [vmem:[#allocation8 + $0x3b0] sm:$0xff] }
 0x617   :  { %v1231_v30 = vmul.f32 %v2725_v14, %v1215_v48  ;;  %v1304_v14 = vld [vmem:[#allocation7 + $0x178] sm:$0xff] }
 0x618   :  { %v2174_v45 = vpack.c.bf16 %v1296_v38, %v1295_v18  ;;  %v2178_v46 = vpack.c.bf16 %v1298_v24, %v1297_v23 }
 0x619   :  { %v1239_v32 = vadd.f32 %v1231_v30, %v1187_v19  ;;  %v1459_v30 = vld [vmem:[#allocation7 + $0x1c8] sm:$0xff]  ;;  %v1463_v19 = vld [vmem:[#allocation8 + $0x3d0] sm:$0xff] }
 0x61a   :  { %2175 = vmatprep.subr.bf16.mxu1 %v2174_v45 }
 0x61b   :  { %v1267_v36 = vpop.permute.xlu1 %1266  ;;  %2177 = vmatpush3.bf16.msra.mxu1 %v2174_v45 }
 0x61c   :  { %v1283_v26 = vmul.f32 %v2731_v44, %v1267_v36  ;;  %2179 = vmatprep.subr.bf16.mxu1 %v2178_v46  ;;  %v1460_v36 = vld [vmem:[#allocation7 + $0x1d0] sm:$0xff] }
 0x61e   :  { %v1291_v54 = vadd.f32 %v1283_v26, %v1239_v32  ;;  %v1462_v26 = vld [vmem:[#allocation8 + $0x3c0] sm:$0xff] }
 0x61f   :  { %v1271_v52 = vpop.permute.xlu1 %1270  ;;  %2181 = vmatpush3.bf16.msra.mxu1 %v2178_v46  ;;  %v1455_v46 = vld [vmem:[#allocation7 + $0x1a8] sm:$0xff] }
 0x620   :  { %v1284_v40 = vmul.f32 %v2731_v44, %v1271_v52  ;;  %v1299_v55 = vmax.f32 %v1291_v54, 0.0  ;;  %v1307_v44 = vld [vmem:[#allocation7 + $0x190] sm:$0xff] }
 0x622   :  { %v1292_v37 = vadd.f32 %v1284_v40, %v1240_v53  ;;  %v1465_v40 = vld [vmem:[#allocation8 + $0x3f0] sm:$0xff] }
 0x624   :  { %v1300_v20 = vmax.f32 %v1292_v37, 0.0 }
 0x626   :  { %v2182_v56 = vpack.c.bf16 %v1300_v20, %v1299_v55  ;;  %v1464_v55 = vld [vmem:[#allocation8 + $0x3e0] sm:$0xff] }
 0x628   :  { %2183 = vmatprep.subr.bf16.mxu1 %v2182_v56 }
 0x629   :  { %2185 = vmatpush3.bf16.msra.mxu1 %v2182_v56 }
 0x62c   :  { %2020 = vmatmul.mubr.msk.f32.vlgmr.msra.gmra.mrb[16].mxu1 %vm413_vm0, %v1302_v10 }
 0x62d   :  { %2022 = vmatprep.mubr.msk.f32.mxu1 %vm413_vm0, %v1303_v16 }
 0x630   :  { %2023 = vmatmul.mubr.msk.f32.gmra.mrb[18].mxu1 %vm413_vm0, %v1304_v14 }
 0x631   :  { %2025 = vmatprep.mubr.msk.f32.mxu1 %vm413_vm0, %v1305_v6 }
 0x634   :  { %2026 = vmatmul.mubr.msk.f32.gmra.mrb[20].mxu1 %vm413_vm0, %v1306_v57  ;;  %v1467_v57 = vld [vmem:[#allocation8 + $0x410] sm:$0xff] }
 0x635   :  { %2028 = vmatprep.mubr.msk.f32.mxu1 %vm413_vm0, %v1307_v44 }
 0x638   :  { %2029 = vmatmul.mubr.msk.f32.gmra.mrb[22].mxu1 %vm413_vm0, %v1308_v25  ;;  %v1466_v25 = vld [vmem:[#allocation8 + $0x400] sm:$0xff] }
 0x639   :  { %2075 = vmatprep.mubr.msk.f32.mxu1 %vm413_vm0, %v1607_v8 }
 0x6ff   :  { %v2021_v27 = vpop.f32.mrb[16].mxu1 }
 0x700   :  { %v1413_v61 = vadd.f32 %v2021_v27, %v1310_v59  ;;  %v1407_v13 = vpop.f32.mrb[17].mxu1 }
 0x701   :  { %v1408_v1 = vadd.f32 %v1407_v13, %v1309_v60 }
 0x702   :  { %v1447_v2 = vmax.f32 %v1413_v61, 0.0 }
 0x703   :  { %v1446_v29 = vmax.f32 %v1408_v1, 0.0  ;;  %v2024_v3 = vpop.f32.mrb[18].mxu1  ;;  %v1469_v1 = vld [vmem:[#allocation8 + $0x430] sm:$0xff] }
 0x704   :  { %v1423_v4 = vadd.f32 %v2024_v3, %v1312_v62  ;;  %v1417_v21 = vpop.f32.mrb[19].mxu1 }
 0x705   :  { %v2186_v5 = vpack.c.bf16 %v1447_v2, %v1446_v29  ;;  %v1418_v63 = vadd.f32 %v1417_v21, %v1311_v12  ;;  %v1468_v2 = vld [vmem:[#allocation8 + $0x420] sm:$0xff] }
 0x706   :  { %v1449_v9 = vmax.f32 %v1423_v4, 0.0 }
 0x707   :  { %2187 = vmatprep.subr.bf16.mxu0 %v2186_v5  ;;  %v1448_v28 = vmax.f32 %v1418_v63, 0.0  ;;  %v2027_v31 = vpop.f32.mrb[20].mxu1 }
 0x708   :  { %2189 = vmatpush3.bf16.msra.mxu0 %v2186_v5  ;;  %v1433_v0 = vadd.f32 %v2027_v31, %v1314_v7  ;;  %v1427_v33 = vpop.f32.mrb[21].mxu1  ;;  %v1610_v31 = vld [vmem:[#allocation7 + $0x1f8] sm:$0xff] }
 0x709   :  { %v2190_v15 = vpack.c.bf16 %v1449_v9, %v1448_v28  ;;  %v1428_v34 = vadd.f32 %v1427_v33, %v1313_v17  ;;  %v1608_v17 = vld [vmem:[#allocation7 + $0x1e8] sm:$0xff]  ;;  %v1609_v28 = vld [vmem:[#allocation7 + $0x1f0] sm:$0xff] }
 0x70a   :  { %v1451_v22 = vmax.f32 %v1433_v0, 0.0  ;;  %v1611_v0 = vld [vmem:[#allocation7 + $0x200] sm:$0xff]  ;;  %v1612_v33 = vld [vmem:[#allocation7 + $0x208] sm:$0xff] }
 0x70b   :  { %2191 = vmatprep.subr.bf16.mxu0 %v2190_v15  ;;  %v1450_v24 = vmax.f32 %v1428_v34, 0.0  ;;  %v2030_v48 = vpop.f32.mrb[22].mxu1  ;;  %v1614_v34 = vld [vmem:[#allocation7 + $0x218] sm:$0xff] }
 0x70c   :  { %2193 = vmatpush3.bf16.msra.mxu0 %v2190_v15  ;;  %v1443_v18 = vadd.f32 %v2030_v48, %v1316_v35  ;;  %v1437_v38 = vpop.f32.mrb[23].mxu1  ;;  %v1613_v15 = vld [vmem:[#allocation7 + $0x210] sm:$0xff]  ;;  %v2419_v35 = vmov 0.0|0.0  }
 0x70d   :  { %v2194_v23 = vpack.c.bf16 %v1451_v22, %v1450_v24  ;;  %v1438_v41 = vadd.f32 %v1437_v38, %v1315_v47  ;;  %v1616_v22 = vld [vmem:[#allocation8 + $0x450] sm:$0xff]  ;;  %v1615_v47 = vld [vmem:[#allocation8 + $0x440] sm:$0xff] }
 0x70e   :  { %v1453_v42 = vmax.f32 %v1443_v18, 0.0 }
 0x70f   :  { %2195 = vmatprep.subr.bf16.mxu0 %v2194_v23  ;;  %v1452_v43 = vmax.f32 %v1438_v41, 0.0 }
 0x710   :  { %2197 = vmatpush3.bf16.msra.mxu0 %v2194_v23  ;;  %v1618_v23 = vld [vmem:[#allocation8 + $0x470] sm:$0xff] }
 0x711   :  { %v2198_v45 = vpack.c.bf16 %v1453_v42, %v1452_v43  ;;  %v1617_v42 = vld [vmem:[#allocation8 + $0x460] sm:$0xff] }
 0x713   :  { %2199 = vmatprep.subr.bf16.mxu0 %v2198_v45 }
 0x714   :  { %2201 = vmatpush3.bf16.msra.mxu0 %v2198_v45 }
 0x715   :  { %2218 = vmatprep.subr.bf16.mxu0 %v2419_v35 }
 0x717   :  { %2048 = vmatmul.mubr.msk.f32.vlgmr.msra.gmra.mrb[32].mxu0 %vm413_vm0, %v1455_v46 }
 0x718   :  { %2050 = vmatprep.mubr.msk.f32.mxu0 %vm413_vm0, %v1456_v49 }
 0x71b   :  { %2051 = vmatmul.mubr.msk.f32.gmra.mrb[34].mxu0 %vm413_vm0, %v1457_v39 }
 0x71c   :  { %2053 = vmatprep.mubr.msk.f32.mxu0 %vm413_vm0, %v1458_v50 }
 0x71f   :  { %2054 = vmatmul.mubr.msk.f32.gmra.mrb[36].mxu0 %vm413_vm0, %v1459_v30  ;;  %v1620_v30 = vld [vmem:[#allocation8 + $0x490] sm:$0xff] }
 0x720   :  { %2056 = vmatprep.mubr.msk.f32.mxu0 %vm413_vm0, %v1460_v36 }
 0x723   :  { %2057 = vmatmul.mubr.msk.f32.gmra.mrb[38].mxu0 %vm413_vm0, %v1461_v51  ;;  %v1619_v51 = vld [vmem:[#allocation8 + $0x480] sm:$0xff] }
 0x724   :  { %2103 = vmatprep.mubr.msk.f32.mxu0 %vm2420_vm3, %v2417_v11 }
 0x7ea   :  { %v2049_v32 = vpop.f32.mrb[32].mxu0 }
 0x7eb   :  { %v1566_v52 = vadd.f32 %v2049_v32, %v1463_v19  ;;  %v1560_v53 = vpop.f32.mrb[33].mxu0 }
 0x7ec   :  { %v1561_v54 = vadd.f32 %v1560_v53, %v1462_v26  ;;  %v1622_v53 = vld [vmem:[#allocation8 + $0x4b0] sm:$0xff] }
 0x7ed   :  { %v1600_v37 = vmax.f32 %v1566_v52, 0.0 }
 0x7ee   :  { %v1599_v20 = vmax.f32 %v1561_v54, 0.0  ;;  %v2052_v56 = vpop.f32.mrb[34].mxu0 }
 0x7ef   :  { %v1576_v10 = vadd.f32 %v2052_v56, %v1465_v40  ;;  %v1570_v16 = vpop.f32.mrb[35].mxu0  ;;  %v1621_v40 = vld [vmem:[#allocation8 + $0x4a0] sm:$0xff] }
 0x7f0   :  { %v2202_v14 = vpack.c.bf16 %v1600_v37, %v1599_v20  ;;  %v1571_v6 = vadd.f32 %v1570_v16, %v1464_v55 }
 0x7f1   :  { %v1602_v44 = vmax.f32 %v1576_v10, 0.0 }
 0x7f2   :  { %v1601_v58 = vmax.f32 %v1571_v6, 0.0  ;;  %v2055_v59 = vpop.f32.mrb[36].mxu0  ;;  %2203 = vmatprep.subr.bf16.mxu1 %v2202_v14 }
 0x7f3   :  { %v1586_v60 = vadd.f32 %v2055_v59, %v1467_v57  ;;  %v1580_v27 = vpop.f32.mrb[37].mxu0  ;;  %2205 = vmatpush3.bf16.msra.mxu1 %v2202_v14 }
 0x7f4   :  { %v2206_v61 = vpack.c.bf16 %v1602_v44, %v1601_v58  ;;  %v1581_v13 = vadd.f32 %v1580_v27, %v1466_v25  ;;  %v1760_v44 = vld [vmem:[#allocation7 + $0x220] sm:$0x3f]  ;;  %v1761_v25 = vld [vmem:[#allocation8 + $0x4c0] sm:$0x3f] }
 0x7f5   :  { %v1604_v62 = vmax.f32 %v1586_v60, 0.0 }
 0x7f6   :  { %v1603_v12 = vmax.f32 %v1581_v13, 0.0  ;;  %v2058_v29 = vpop.f32.mrb[38].mxu0  ;;  %2207 = vmatprep.subr.bf16.mxu1 %v2206_v61 }
 0x7f7   :  { %v1596_v3 = vadd.f32 %v2058_v29, %v1469_v1  ;;  %v1590_v4 = vpop.f32.mrb[39].mxu0  ;;  %2209 = vmatpush3.bf16.msra.mxu1 %v2206_v61 }
 0x7f8   :  { %v2210_v21 = vpack.c.bf16 %v1604_v62, %v1603_v12  ;;  %v1591_v5 = vadd.f32 %v1590_v4, %v1468_v2 }
 0x7f9   :  { %v1606_v63 = vmax.f32 %v1596_v3, 0.0 }
 0x7fa   :  { %v1605_v7 = vmax.f32 %v1591_v5, 0.0  ;;  %2211 = vmatprep.subr.bf16.mxu1 %v2210_v21 }
 0x7fb   :  { %2213 = vmatpush3.bf16.msra.mxu1 %v2210_v21 }
 0x7fc   :  { %v2214_v9 = vpack.c.bf16 %v1606_v63, %v1605_v7 }
 0x7fe   :  { %2215 = vmatprep.subr.bf16.mxu1 %v2214_v9 }
 0x7ff   :  { %2217 = vmatpush3.bf16.msra.mxu1 %v2214_v9 }
 0x802   :  { %2076 = vmatmul.mubr.msk.f32.vlgmr.msra.gmra.mrb[24].mxu1 %vm413_vm0, %v1608_v17 }
 0x803   :  { %2078 = vmatprep.mubr.msk.f32.mxu1 %vm413_vm0, %v1609_v28 }
 0x806   :  { %2079 = vmatmul.mubr.msk.f32.gmra.mrb[26].mxu1 %vm413_vm0, %v1610_v31 }
 0x807   :  { %2081 = vmatprep.mubr.msk.f32.mxu1 %vm413_vm0, %v1611_v0 }
 0x80a   :  { %2082 = vmatmul.mubr.msk.f32.gmra.mrb[28].mxu1 %vm413_vm0, %v1612_v33 }
 0x80b   :  { %2084 = vmatprep.mubr.msk.f32.mxu1 %vm413_vm0, %v1613_v15 }
 0x80e   :  { %2085 = vmatmul.mubr.msk.f32.gmra.mrb[30].mxu1 %vm413_vm0, %v1614_v34 }
 0x8d5   :  { %v2077_v24 = vpop.f32.mrb[24].mxu1 }
 0x8d6   :  { %v1719_v48 = vadd.f32 %v2077_v24, %v1616_v22  ;;  %v1713_v18 = vpop.f32.mrb[25].mxu1 }
 0x8d7   :  { %v1714_v38 = vadd.f32 %v1713_v18, %v1615_v47 }
 0x8d8   :  { %v1753_v41 = vmax.f32 %v1719_v48, 0.0 }
 0x8d9   :  { %v1752_v43 = vmax.f32 %v1714_v38, 0.0  ;;  %v2080_v45 = vpop.f32.mrb[26].mxu1 }
 0x8da   :  { %v1729_v46 = vadd.f32 %v2080_v45, %v1618_v23  ;;  %v1723_v49 = vpop.f32.mrb[27].mxu1 }
 0x8db   :  { %v2219_v39 = vpack.c.bf16 %v1753_v41, %v1752_v43  ;;  %v1724_v50 = vadd.f32 %v1723_v49, %v1617_v42 }
 0x8dc   :  { %v1755_v36 = vmax.f32 %v1729_v46, 0.0 }
 0x8dd   :  { %v1754_v8 = vmax.f32 %v1724_v50, 0.0  ;;  %v2083_v11 = vpop.f32.mrb[28].mxu1  ;;  %2220 = vmatpush3.bf16.msra.mxu0 %v2219_v39 }
 0x8de   :  { %v1739_v19 = vadd.f32 %v2083_v11, %v1620_v30  ;;  %v1733_v26 = vpop.f32.mrb[29].mxu1  ;;  %2221 = vmatprep.subr.bf16.mxu0 %v2419_v35 }
 0x8df   :  { %v2222_v32 = vpack.c.bf16 %v1755_v36, %v1754_v8  ;;  %v1734_v52 = vadd.f32 %v1733_v26, %v1619_v51 }
 0x8e0   :  { %v1757_v54 = vmax.f32 %v1739_v19, 0.0 }
 0x8e1   :  { %v1756_v37 = vmax.f32 %v1734_v52, 0.0  ;;  %v2086_v55 = vpop.f32.mrb[30].mxu1  ;;  %2223 = vmatpush3.bf16.msra.mxu0 %v2222_v32 }
 0x8e2   :  { %v1749_v20 = vadd.f32 %v2086_v55, %v1622_v53  ;;  %v1743_v56 = vpop.f32.mrb[31].mxu1  ;;  %2224 = vmatprep.subr.bf16.mxu0 %v2419_v35 }
 0x8e3   :  { %v2225_v10 = vpack.c.bf16 %v1757_v54, %v1756_v37  ;;  %v1744_v16 = vadd.f32 %v1743_v56, %v1621_v40 }
 0x8e4   :  { %v1759_v14 = vmax.f32 %v1749_v20, 0.0 }
 0x8e5   :  { %v1758_v6 = vmax.f32 %v1744_v16, 0.0  ;;  %2226 = vmatpush3.bf16.msra.mxu0 %v2225_v10 }
 0x8e6   :  { %2227 = vmatprep.subr.bf16.mxu0 %v2419_v35 }
 0x8e7   :  { %v2228_v57 = vpack.c.bf16 %v1759_v14, %v1758_v6 }
 0x8e9   :  { %2229 = vmatpush3.bf16.msra.mxu0 %v2228_v57 }
 0x8ec   :  { %2104 = vmatmul.mubr.msk.f32.vlgmr.msra.gmra.mrb[40].mxu0 %vm413_vm0, %v1760_v44 }
 0x9bf   :  { %v1831_v58 = vpop.f32.mrb[40].mxu0 }
 0x9c0   :  { %v1832_v59 = vadd.f32 %v1831_v58, %v1761_v25  ;;  %v2105_v60 = vpop.f32.mrb[41].mxu0 }
 0x9c2   :  { %1835 = vst [vmem:[#allocation10] sm:$0x3f] %v1832_v59 }
 0x9c3   :  { %2387 = shalt.err (!%p2384_p8)
}
 0x9c4   :  { %s2388_s15 = scalar_lea.hbm %s2818_s4, 128 }
 0x9c5   :  { %p2389_p9 = scmp.ne.s32.totalorder %s2818_s4, %s2388_s15  ;;  %p2392_p10 = scmp.lt.u32.totalorder %s2388_s15, %s2818_s4 }
 0x9c7   :  { %p2394_p11 = pnand %p2392_p10, %p2389_p9 }
 0x9c9   :  { %2397 = shalt.err (!%p2394_p11)
}
 0x9ca   :  { %1845 = dma.vmem_to_hbm [thread:$0]  %s1843_s11, 128, %s2818_s4, [#allocation4]  }
 0x9cb   :  { %2404 = dma.done.wait [#allocation4], 128  }
 0x9cc   :  { %2405 = vsyncadd [#allocation4], 4294967168 }
 0x9cd   :  { %1849 = vsyncpa [#allocation3], 1 }
 0x9ce   :  { %1850 = vsyncpa [#allocation6], 1 }
 0x9cf   :  { %1851 = vsyncpa [#allocation9], 1 }
 0x9d0   :  { %1852 = vsyncpa [#allocation4], 1 }

</bundles_post_ra>
